<compile_context>
chip_gen: v7x
topology: tpu7x:2x2x1
jax: 0.10.0
libtpu: 0.0.40
codegen_flags: <defaults>
</compile_context>

<pallas_src>
import math

import jax
import jax.numpy as jnp
from jax.experimental import pallas as pl
from jax.experimental.pallas import tpu as pltpu


def _round_up(x, m):
    return ((x + m - 1) // m) * m


def _largest_aligned_divisor(n, cap, mult):
    """Largest d <= cap with d % mult == 0 and n % d == 0, else None."""
    d = (min(cap, n) // mult) * mult
    while d >= mult:
        if n % d == 0:
            return d
        d -= mult
    return None


def _choose_pack_k(R, W, max_segments=64):
    """Rows folded into one lane-dense 'super row'.

    Smallest k with k | R such that k*W is a multiple of 128 (input AND output
    lane-dense); failing that, k*W a multiple of 32 (output 4kW lane-dense);
    failing that, 1 (original layout, masked DMA but still correct).
    """
    for quantum in (128, 32):
        k0 = quantum // math.gcd(W, quantum)
        if k0 > max_segments:
            continue
        k = k0
        while k <= max_segments:
            if R % k == 0:
                return k
            k += k0
    return 1


def _choose_r_blk(Rp, out_row_bytes, row_mult, target_out_bytes=8 << 20):
    """Packed rows per grid step: ~8 MiB output tiles, even #steps (v7x TCs)."""
    if Rp <= row_mult:
        return Rp                                   # full-extent block (always legal)
    budget = max(row_mult,
                 (target_out_bytes // out_row_bytes) // row_mult * row_mult)
    steps = max(2, -(-Rp // budget))                # >=2: pipelining + both v7x cores
    if steps % 2:
        steps += 1                                  # even split across the two v7x TCs
    r_blk = _round_up(-(-Rp // steps), row_mult)
    return max(row_mult, min(r_blk, _round_up(Rp, row_mult)))


def _choose_sub(r_blk, kw, itemsize, row_mult, target_chunk_bytes=32 << 10):
    """Rows per in-kernel chunk (live bytes ~3x chunk -> stay well under 64 vregs)."""
    rows = max(row_mult, target_chunk_bytes // max(1, kw * itemsize))
    sub = _largest_aligned_divisor(r_blk, rows, row_mult)
    return r_blk if sub is None else sub


def _make_upsample_kernel(r_blk, w, k, sub):
    """Kernel for blocks of shape (r_blk, k*W) -> (r_blk, 4*k*W)."""
    two_w, four_w = 2 * w, 4 * w
    n_sub = max(1, r_blk // sub)

    def kernel(x_ref, o_ref):
        def process(r0):
            rows = pl.ds(r0, sub)
            x = x_ref[rows, :]                       # (sub, k*W)
            # Lane duplication once per chunk.  jnp.repeat lowers to an
            # in-register lane interleave (XLU), free under the HBM roofline.
            y = jnp.repeat(x, 2, axis=-1)            # (sub, 2*k*W)
            # Per W-segment, output rows 2h and 2h+1 are the two contiguous
            # 2W-wide lane windows of the 4W-wide output segment, so sublane
            # duplication is just two stores of the same registers.
            for j in range(k):
                yj = y if k == 1 else y[:, two_w * j:two_w * (j + 1)]
                o_ref[rows, pl.ds(four_w * j, two_w)] = yj
                o_ref[rows, pl.ds(four_w * j + two_w, two_w)] = yj

        if n_sub == 1:
            process(0)
        else:
            @pl.loop(0, n_sub, unroll=(n_sub <= 4))
            def _(i):
                process(pl.multiple_of(i * sub, sub))

    return kernel


def bright_upsample(x):
    """Nearest-neighbour 2x upsample of an NCHW tensor via a Pallas TPU kernel."""
    N, C, H, W = x.shape
    R = N * C * H
    itemsize = jnp.dtype(x.dtype).itemsize
    row_mult = max(8, 32 // itemsize)       # sublane packing: 8 f32 / 16 bf16 / 32 i8

    k = _choose_pack_k(R, W)                # lane-dense "super rows" for small W
    Rp, kW = R // k, k * W

    r_blk = _choose_r_blk(Rp, 4 * kW * itemsize, row_mult)
    sub = _choose_sub(r_blk, kW, itemsize, row_mult)
    grid = (pl.cdiv(Rp, r_blk),)            # masked tail block if r_blk does not divide Rp

    x2 = x.reshape(Rp, kW)                  # contiguous, free

    out2 = pl.pallas_call(
        _make_upsample_kernel(r_blk, W, k, sub),
        out_shape=jax.ShapeDtypeStruct((Rp, 4 * kW), x.dtype),
        grid_spec=pltpu.PrefetchScalarGridSpec(
            num_scalar_prefetch=0,
            grid=grid,
            in_specs=[pl.BlockSpec((r_blk, kW), lambda i: (i, 0))],
            out_specs=pl.BlockSpec((r_blk, 4 * kW), lambda i: (i, 0)),
        ),
        compiler_params=pltpu.CompilerParams(
            dimension_semantics=("parallel",),
            vmem_limit_bytes=48 * 1024 * 1024,   # fits ~20 MiB double-buffered tiles,
                                                 # headroom under v7x's 64 MiB VMEM
        ),
        cost_estimate=pl.CostEstimate(
            flops=0,
            transcendentals=0,
            bytes_accessed=5 * R * W * itemsize,  # 1x read + 4x write
        ),
    )(x2)

    # Contiguous metadata reshape: (R/k, 4kW) -> (N, C, 2H, 2W).
    return out2.reshape(N, C, 2 * H, 2 * W)


if __name__ == "__main__":
    # Bright_UpSample has no learnable parameters (the `channel` arg is unused).
    key = jax.random.PRNGKey(0)
    N, C, H, W = 2, 4, 16, 16
    x = jax.random.normal(key, (N, C, H, W), dtype=jnp.float32)

    out = jax.block_until_ready(bright_upsample(x))

    # Reference: plain-JAX nearest-neighbour 2x upsample (exact data duplication).
    ref = jnp.repeat(jnp.repeat(x, 2, axis=2), 2, axis=3)

    assert out.shape == (N, C, 2 * H, 2 * W), out.shape
    assert out.dtype == x.dtype, out.dtype
    assert jnp.array_equal(out, ref), "mismatch vs. nearest-neighbour reference"

    print("KERNEL_OK")
</pallas_src>

<mosaic_0001>
module attributes {stable_mosaic.version = 11 : i64} {
  func.func @kernel(%arg0: i32, %arg1: memref<8x128xf32, #tpu.memory_space<vmem>>, %arg2: memref<8x512xf32, #tpu.memory_space<vmem>>) attributes {dimension_semantics = [#tpu.dimension_semantics<parallel>], iteration_bounds = array<i64: 2>, scalar_prefetch = 0 : i64, scratch_operands = 0 : i64, tpu.core_type = #tpu.core_type<tc>, window_params = [{transform_indices = @transform_0, window_bounds = array<i64: 8, 128>}, {transform_indices = @transform_1, window_bounds = array<i64: 8, 512>}]} {
    %c0 = arith.constant 0 : index
    %c0_0 = arith.constant 0 : index
    %0 = vector.load %arg1[%c0, %c0_0] : memref<8x128xf32, #tpu.memory_space<vmem>>, vector<8x128xf32>
    %1 = vector.shape_cast %0 : vector<8x128xf32> to vector<8x128x1xf32>
    %2 = vector.broadcast %1 : vector<8x128x1xf32> to vector<8x128x2xf32>
    %3 = vector.shape_cast %2 : vector<8x128x2xf32> to vector<8x256xf32>
    %4 = vector.extract_strided_slice %3 {offsets = [0, 0], sizes = [8, 32], strides = [1, 1]} : vector<8x256xf32> to vector<8x32xf32>
    %c0_1 = arith.constant 0 : index
    %c0_2 = arith.constant 0 : index
    %5 = vector.load %arg2[%c0_1, %c0_2] : memref<8x512xf32, #tpu.memory_space<vmem>>, vector<8x32xf32>
    tpu.vector_store %arg2[%c0_1, %c0_2], %4 {strides = array<i32>} : memref<8x512xf32, #tpu.memory_space<vmem>>, vector<8x32xf32>,
    %c0_3 = arith.constant 0 : index
    %c32 = arith.constant 32 : index
    %6 = vector.load %arg2[%c0_3, %c32] : memref<8x512xf32, #tpu.memory_space<vmem>>, vector<8x32xf32>
    tpu.vector_store %arg2[%c0_3, %c32], %4 {strides = array<i32>} : memref<8x512xf32, #tpu.memory_space<vmem>>, vector<8x32xf32>,
    %7 = vector.extract_strided_slice %3 {offsets = [0, 32], sizes = [8, 32], strides = [1, 1]} : vector<8x256xf32> to vector<8x32xf32>
    %c0_4 = arith.constant 0 : index
    %c64 = arith.constant 64 : index
    %8 = vector.load %arg2[%c0_4, %c64] : memref<8x512xf32, #tpu.memory_space<vmem>>, vector<8x32xf32>
    tpu.vector_store %arg2[%c0_4, %c64], %7 {strides = array<i32>} : memref<8x512xf32, #tpu.memory_space<vmem>>, vector<8x32xf32>,
    %c0_5 = arith.constant 0 : index
    %c96 = arith.constant 96 : index
    %9 = vector.load %arg2[%c0_5, %c96] : memref<8x512xf32, #tpu.memory_space<vmem>>, vector<8x32xf32>
    tpu.vector_store %arg2[%c0_5, %c96], %7 {strides = array<i32>} : memref<8x512xf32, #tpu.memory_space<vmem>>, vector<8x32xf32>,
    %10 = vector.extract_strided_slice %3 {offsets = [0, 64], sizes = [8, 32], strides = [1, 1]} : vector<8x256xf32> to vector<8x32xf32>
    %c0_6 = arith.constant 0 : index
    %c128 = arith.constant 128 : index
    %11 = vector.load %arg2[%c0_6, %c128] : memref<8x512xf32, #tpu.memory_space<vmem>>, vector<8x32xf32>
    tpu.vector_store %arg2[%c0_6, %c128], %10 {strides = array<i32>} : memref<8x512xf32, #tpu.memory_space<vmem>>, vector<8x32xf32>,
    %c0_7 = arith.constant 0 : index
    %c160 = arith.constant 160 : index
    %12 = vector.load %arg2[%c0_7, %c160] : memref<8x512xf32, #tpu.memory_space<vmem>>, vector<8x32xf32>
    tpu.vector_store %arg2[%c0_7, %c160], %10 {strides = array<i32>} : memref<8x512xf32, #tpu.memory_space<vmem>>, vector<8x32xf32>,
    %13 = vector.extract_strided_slice %3 {offsets = [0, 96], sizes = [8, 32], strides = [1, 1]} : vector<8x256xf32> to vector<8x32xf32>
    %c0_8 = arith.constant 0 : index
    %c192 = arith.constant 192 : index
    %14 = vector.load %arg2[%c0_8, %c192] : memref<8x512xf32, #tpu.memory_space<vmem>>, vector<8x32xf32>
    tpu.vector_store %arg2[%c0_8, %c192], %13 {strides = array<i32>} : memref<8x512xf32, #tpu.memory_space<vmem>>, vector<8x32xf32>,
    %c0_9 = arith.constant 0 : index
    %c224 = arith.constant 224 : index
    %15 = vector.load %arg2[%c0_9, %c224] : memref<8x512xf32, #tpu.memory_space<vmem>>, vector<8x32xf32>
    tpu.vector_store %arg2[%c0_9, %c224], %13 {strides = array<i32>} : memref<8x512xf32, #tpu.memory_space<vmem>>, vector<8x32xf32>,
    %16 = vector.extract_strided_slice %3 {offsets = [0, 128], sizes = [8, 32], strides = [1, 1]} : vector<8x256xf32> to vector<8x32xf32>
    %c0_10 = arith.constant 0 : index
    %c256 = arith.constant 256 : index
    %17 = vector.load %arg2[%c0_10, %c256] : memref<8x512xf32, #tpu.memory_space<vmem>>, vector<8x32xf32>
    tpu.vector_store %arg2[%c0_10, %c256], %16 {strides = array<i32>} : memref<8x512xf32, #tpu.memory_space<vmem>>, vector<8x32xf32>,
    %c0_11 = arith.constant 0 : index
    %c288 = arith.constant 288 : index
    %18 = vector.load %arg2[%c0_11, %c288] : memref<8x512xf32, #tpu.memory_space<vmem>>, vector<8x32xf32>
    tpu.vector_store %arg2[%c0_11, %c288], %16 {strides = array<i32>} : memref<8x512xf32, #tpu.memory_space<vmem>>, vector<8x32xf32>,
    %19 = vector.extract_strided_slice %3 {offsets = [0, 160], sizes = [8, 32], strides = [1, 1]} : vector<8x256xf32> to vector<8x32xf32>
    %c0_12 = arith.constant 0 : index
    %c320 = arith.constant 320 : index
    %20 = vector.load %arg2[%c0_12, %c320] : memref<8x512xf32, #tpu.memory_space<vmem>>, vector<8x32xf32>
    tpu.vector_store %arg2[%c0_12, %c320], %19 {strides = array<i32>} : memref<8x512xf32, #tpu.memory_space<vmem>>, vector<8x32xf32>,
    %c0_13 = arith.constant 0 : index
    %c352 = arith.constant 352 : index
    %21 = vector.load %arg2[%c0_13, %c352] : memref<8x512xf32, #tpu.memory_space<vmem>>, vector<8x32xf32>
    tpu.vector_store %arg2[%c0_13, %c352], %19 {strides = array<i32>} : memref<8x512xf32, #tpu.memory_space<vmem>>, vector<8x32xf32>,
    %22 = vector.extract_strided_slice %3 {offsets = [0, 192], sizes = [8, 32], strides = [1, 1]} : vector<8x256xf32> to vector<8x32xf32>
    %c0_14 = arith.constant 0 : index
    %c384 = arith.constant 384 : index
    %23 = vector.load %arg2[%c0_14, %c384] : memref<8x512xf32, #tpu.memory_space<vmem>>, vector<8x32xf32>
    tpu.vector_store %arg2[%c0_14, %c384], %22 {strides = array<i32>} : memref<8x512xf32, #tpu.memory_space<vmem>>, vector<8x32xf32>,
    %c0_15 = arith.constant 0 : index
    %c416 = arith.constant 416 : index
    %24 = vector.load %arg2[%c0_15, %c416] : memref<8x512xf32, #tpu.memory_space<vmem>>, vector<8x32xf32>
    tpu.vector_store %arg2[%c0_15, %c416], %22 {strides = array<i32>} : memref<8x512xf32, #tpu.memory_space<vmem>>, vector<8x32xf32>,
    %25 = vector.extract_strided_slice %3 {offsets = [0, 224], sizes = [8, 32], strides = [1, 1]} : vector<8x256xf32> to vector<8x32xf32>
    %c0_16 = arith.constant 0 : index
    %c448 = arith.constant 448 : index
    %26 = vector.load %arg2[%c0_16, %c448] : memref<8x512xf32, #tpu.memory_space<vmem>>, vector<8x32xf32>
    tpu.vector_store %arg2[%c0_16, %c448], %25 {strides = array<i32>} : memref<8x512xf32, #tpu.memory_space<vmem>>, vector<8x32xf32>,
    %c0_17 = arith.constant 0 : index
    %c480 = arith.constant 480 : index
    %27 = vector.load %arg2[%c0_17, %c480] : memref<8x512xf32, #tpu.memory_space<vmem>>, vector<8x32xf32>
    tpu.vector_store %arg2[%c0_17, %c480], %25 {strides = array<i32>} : memref<8x512xf32, #tpu.memory_space<vmem>>, vector<8x32xf32>,
    return
  }
  func.func @transform_0(%arg0: i32) -> (i32, i32) {
    %c0_i32 = arith.constant 0 : i32
    %c0_i32_0 = arith.constant 0 : i32
    return %arg0, %c0_i32 : i32, i32
  }
  func.func @transform_1(%arg0: i32) -> (i32, i32) {
    %c0_i32 = arith.constant 0 : i32
    %c0_i32_0 = arith.constant 0 : i32
    return %arg0, %c0_i32 : i32, i32
  }
}

</mosaic_0001>

<bundles_post_ra>
// kernel: tpu_custom_call.1
= control target key start
LH: loop header
LB: loop body
LE: loop exit
PB: predicated region body
PF: predicated region fallthrough
CT: control target
= control target key end

     0   :  { %6 = vsyncpa [#allocation3], 0  ;;  %s5314_s0 = inlined_call_operand.hbm [shape: f32[16,128], index: 0, kind: input, shape index: {}]   ;;  %s5315_s1 = inlined_call_operand.hbm [shape: f32[16,512], index: 1, kind: output, shape index: {}]  }
   0x1   :  { %8 = vsyncpa [#allocation3 + $0x1], 0 }
   0x2   :  { %9 = vsyncpa [#allocation4], 0 }
   0x3   :  { %11 = vsyncpa [#allocation4 + $0x1], 0  ;;  %s3962_s6 = smov 0   ;;  %s3964_s7 = smov 0  }
   0x4   :  { %s3966_s8 = smov 0   ;;  %s3968_s9 = smov 0  }
   0x5 LB: > { %s3983_s10 = sadd.s32 4294967295, %s3883_s9   ;;  %s3662_s11 = sadd.s32 4294967294, %s3883_s9   ;;  %s3883_s9 = sphi %s3968_s9, %s5667_s9   ;;  %s3879_s8 = sphi %s3966_s8, %s5666_s8   ;;  %s3875_s7 = sphi %s3964_s7, %s5665_s7   ;;  %s3871_s6 = sphi %s3962_s6, %s5664_s6  }
   0x6   : > { %s3987_s12 = sadd.s32 1, %s3883_s9   ;;  %s24_s13 = sadd.s32 1, %s3879_s8 }
   0x7   : > { %s21_s14 = ssub.s32 %s3883_s9, %s3987_s12  ;;  %p31_p0 = scmp.ne.s32.totalorder %s3879_s8, %s3875_s7 }
   0x8   : > { %p22_p1 = scmp.eq.s32.totalorder %s21_s14, 0  ;;  %p32_p2 = scmp.eq.s32.totalorder %s3883_s9, 0 }
   0x9   : > { %p37_p3 = scmp.ne.s32.totalorder %s3875_s7, %s3871_s6  ;;  %p38_p4 = scmp.eq.s32.totalorder %s3983_s10, 0 }
   0xa   : > { %s3999_s15 = scalar_select %p22_p1, %s3879_s8, %s24_s13  }
   0xb   : > { %p4001_p5 = por %p32_p2, %p31_p0  ;;  %p4005_p6 = por %p38_p4, %p37_p3 }
   0xc   : > { %p61_p7 = scmp.eq.s32.totalorder %s3983_s10, 1  ;;  %p67_p8 = scmp.eq.s32.totalorder %s3662_s11, 1 }
   0xd   : > { %p3688_p10 = scmp.lt.s32.totalorder %s3883_s9, 2  ;;  %s87_s20 = sand.u32 1, %s3879_s8  }
   0xe   : > { %p4012_p11 = por %p61_p7, %p31_p0  ;;  %p4016_p12 = por %p67_p8, %p37_p3 }
   0xf   : > { %s3666_s21 = sshll.u32 %s3883_s9, 7  ;;  %s3665_s22 = sshll.u32 %s87_s20, 3 }
  0x10   : > { %s5447_s18 = scalar_select %p4012_p11, 1, 0 }
  0x11   : > { %s5448_s19 = scalar_select %p4016_p12, 1, 0 }
  0x12   : > { %s4025_s25 = scalar_lea.hbm %s5314_s0, %s3666_s21  ;;  %s91_s26 = scalar_lea.vmem [#allocation2], %s3665_s22 }
  0x13   : > { %s98_s27 = sshll.u32 %s91_s26, 4  ;;  %p4029_p13 = pnand %p3688_p10, %p4001_p5  ;;  %s4033_s27 = int_to_ptr.vmem [resolvable:$true] %s98_s27 }
  0x14   : > { %s88_s29 = scalar_lea.sflag [#allocation3], %s87_s20  ;;  %s3787_s30 = scalar_lea.hbm %s4025_s25, 128 }
  0x15   : > { %p3788_p2 = scmp.ne.s32.totalorder %s4025_s25, %s3787_s30  ;;  %p3789_p3 = pneg %p4029_p13 }
  0x16   : > { %s3792_s4 = scalar_lea.hbm %s5314_s0, 256  ;;  %p3793_p5 = scmp.lt.u32.totalorder %s4025_s25, %s5314_s0 }
  0x17   : > { %p3790_p4 = pnand %p3789_p3, %p3788_p2  ;;  %p3794_p8 = scmp.lt.u32.totalorder %s3792_s4, %s3787_s30 }
  0x18   : > { %p3796_p9 = scmp.lt.u32.totalorder %s3787_s30, %s4025_s25 }
  0x19   : > { %p3791_p7 = pneg %p3790_p4  ;;  %p3795_p10 = por %p3794_p8, %p3793_p5 }
  0x1b   : > { %p3797_p0 = por %p3796_p9, %p3795_p10 }
  0x1d   : > { %p3798_p1 = pnand %p3797_p0, %p3791_p7 }
  0x1f   : > { %3801 = shalt.err (!%p3798_p1)
}
  0x20   : > { %s3802_s13 = scalar_lea.vmem %s4033_s27, 128  ;;  %s3885_s14 = smov [#allocation2]  }
  0x21   : > { %p3803_p2 = scmp.ne.s32.totalorder %s4033_s27, %s3802_s13  ;;  %s3807_s16 = sshll.u32 %s3885_s14, 4  ;;  %s3808_s16 = int_to_ptr.vmem [resolvable:$false] %s3807_s16 }
  0x22   : > { %s3809_s20 = scalar_lea.vmem %s3808_s16, 256  ;;  %p3810_p11 = scmp.lt.s32.totalorder %s4033_s27, %s3808_s16 }
  0x23   : > { %p3805_p4 = pnand %p3803_p2, %p3789_p3  ;;  %p3811_p5 = scmp.lt.s32.totalorder %s3809_s20, %s3802_s13 }
  0x25   : > { %p3806_p12 = pneg %p3805_p4  ;;  %p3812_p8 = por %p3811_p5, %p3810_p11 }
  0x27   : > { %p3813_p9 = pnand %p3812_p8, %p3806_p12 }
  0x29   : > { %3816 = shalt.err (!%p3813_p9)
}
  0x2a   : > { %3683 = dma.hbm_to_vmem [thread:$0]  (!%p4029_p13), %s4025_s25, 128, %s4033_s27, %s88_s29  }
  0x2b   : > { %p5450_p0 = scmp.lt.s32.totalorder %s3883_s9, 3  ;;  %p5451_p1 = scmp.ge.s32.totalorder %s3883_s9, 1 }
  0x2d   : > { %p104_p3 = pnand %p5451_p1, %p5450_p0 }
  0x2f   : > { %107 = sbr.rel (%p104_p3) target bundleno = 919 (0x397), region = 24 }
  0x36   : > { %s4067_s21 = sand.u32 1, %s3875_s7  }
  0x37   : > { %s3668_s22 = sshll.u32 %s4067_s21, 3  ;;  %s110_s23 = scalar_lea.sflag [#allocation3], %s4067_s21 }
  0x38   : > { %s113_s24 = scalar_lea.vmem [#allocation2], %s3668_s22 }
  0x39   : > { %3862 = dma.done.wait (%p4005_p6), %s110_s23, 128  }
  0x3a   : > { %3864 = vsyncadd (%p4005_p6), %s110_s23, 4294967168  ;;  %v133_v0 = vlaneseq  ;;  %v4078_v3 = vld [vmem:[%s113_s24] sm:$0xff]  ;;  %s3888_s17 = smov 4   ;;  %s3889_s25 = smov 2   ;;  %vm3349_vm0 = vcmask 15360   ;;  %vm3351_vm1 = vcmask 31744  }
  0x3b   : > { %s3890_s26 = smov 8   ;;  %s3891_s27 = smov 6   ;;  %vm3353_vm2 = vcmask 48128   ;;  %vm3355_vm3 = vcmask 64512   ;;  %vm3357_vm4 = vcmask 80896   ;;  %vm3359_vm5 = vcmask 97280  }
  0x3c   : > { %v4075_v1 = vshrl.u32 %v133_v0, 7  ;;  %s3892_s28 = smov 12   ;;  %s3893_s29 = smov 10   ;;  %vm3361_vm6 = vcmask 113664   ;;  %vm3363_vm7 = vcmask 130048   ;;  %vm3365_vm8 = vcmask 146432  }
  0x3d   : > { %s3894_s30 = smov 14   ;;  %s3895_s2 = smov 16   ;;  %vm3367_vm9 = vcmask 162816   ;;  %vm3369_vm10 = vcmask 179200   ;;  %vm3371_vm11 = vcmask 195584   ;;  %vm5420_vm12 = vcmask 211968  }
  0x3e   : > { %v135_v2 = vsub.s32 0, %v4075_v1  ;;  %v202_v5 = vsub.s32 1, %v4075_v1  ;;  %v269_v7 = vsub.s32 2, %v4075_v1  ;;  %v336_v9 = vsub.s32 3, %v4075_v1  ;;  %s3896_s3 = smov 18   ;;  %s3897_s4 = smov 20  }
  0x3f   : > { %v403_v15 = vsub.s32 4, %v4075_v1  ;;  %v470_v33 = vsub.s32 5, %v4075_v1  ;;  %v537_v51 = vsub.s32 6, %v4075_v1  ;;  %s3898_s5 = smov 22   ;;  %s3899_s11 = smov 24   ;;  %vm5422_vm13 = vcmask 228352  }
  0x40   : > { %v136_v4 = vrot.slane %v4078_v3, %v135_v2  ;;  %v203_v6 = vrot.slane %v4078_v3, %v202_v5  ;;  %v270_v8 = vrot.slane %v4078_v3, %v269_v7  ;;  %v337_v10 = vrot.slane %v4078_v3, %v336_v9  ;;  %s3900_s13 = smov 26   ;;  %s3901_s14 = smov 28  }
  0x41   : > { %v404_v18 = vrot.slane %v4078_v3, %v403_v15  ;;  %v471_v36 = vrot.slane %v4078_v3, %v470_v33  ;;  %v538_v54 = vrot.slane %v4078_v3, %v537_v51  ;;  %v3886_v5 = vmov 1983009808   ;;  %s3902_s16 = smov 30   ;;  %s5410_s20 = smov 32  }
  0x42   : > { %146 = vbcast.lane.b32.xlu1 %v136_v4, 272  ;;  %138 = vbcast.lane.b32.xlu0 %v136_v4, 256  ;;  %v604_v9 = vsub.s32 7, %v4075_v1  ;;  %s5407_s22 = smov 34   ;;  %s5396_s23 = smov 36   ;;  %vm5421_vm14 = vcmask 244736  }
  0x43   : > { %s5397_s24 = smov 38   ;;  %vm5424_vm15 = vcmask 261120   ;;  %p5661_p11 = scmp.ne.s32.totalorder %s5447_s18, 0 }
  0x44   : > { %v605_v51 = vrot.slane %v4078_v3, %v604_v9 }
  0x46   : > { %150 = vbcast.lane.b32.xlu1 %v136_v4, 280  ;;  %142 = vbcast.lane.b32.xlu0 %v136_v4, 264 }
  0x4a   : > { %158 = vbcast.lane.b32.xlu1 %v136_v4, 296  ;;  %154 = vbcast.lane.b32.xlu0 %v136_v4, 288 }
  0x4e   : > { %166 = vbcast.lane.b32.xlu1 %v136_v4, 312  ;;  %162 = vbcast.lane.b32.xlu0 %v136_v4, 304 }
  0x52   : > { %174 = vbcast.lane.b32.xlu1 %v136_v4, 328  ;;  %170 = vbcast.lane.b32.xlu0 %v136_v4, 320 }
  0x56   : > { %182 = vbcast.lane.b32.xlu1 %v136_v4, 344  ;;  %178 = vbcast.lane.b32.xlu0 %v136_v4, 336 }
  0x5a   : > { %190 = vbcast.lane.b32.xlu1 %v136_v4, 360  ;;  %186 = vbcast.lane.b32.xlu0 %v136_v4, 352 }
  0x5e   : > { %198 = vbcast.lane.b32.xlu1 %v136_v4, 376  ;;  %194 = vbcast.lane.b32.xlu0 %v136_v4, 368 }
  0x62   : > { %209 = vbcast.lane.b32.xlu1 %v203_v6, 264  ;;  %205 = vbcast.lane.b32.xlu0 %v203_v6, 256 }
  0x66   : > { %217 = vbcast.lane.b32.xlu1 %v203_v6, 280  ;;  %213 = vbcast.lane.b32.xlu0 %v203_v6, 272 }
  0x6a   : > { %225 = vbcast.lane.b32.xlu1 %v203_v6, 296  ;;  %221 = vbcast.lane.b32.xlu0 %v203_v6, 288 }
  0x6e   : > { %233 = vbcast.lane.b32.xlu1 %v203_v6, 312  ;;  %229 = vbcast.lane.b32.xlu0 %v203_v6, 304 }
  0x72   : > { %241 = vbcast.lane.b32.xlu1 %v203_v6, 328  ;;  %237 = vbcast.lane.b32.xlu0 %v203_v6, 320 }
  0x76   : > { %249 = vbcast.lane.b32.xlu1 %v203_v6, 344  ;;  %245 = vbcast.lane.b32.xlu0 %v203_v6, 336 }
  0x7a   : > { %257 = vbcast.lane.b32.xlu1 %v203_v6, 360  ;;  %253 = vbcast.lane.b32.xlu0 %v203_v6, 352 }
  0x7e   : > { %265 = vbcast.lane.b32.xlu1 %v203_v6, 376  ;;  %261 = vbcast.lane.b32.xlu0 %v203_v6, 368  ;;  %v672_v6 = vunpack.c.l.s4 %v3886_v5 }
  0x82   : > { %276 = vbcast.lane.b32.xlu1 %v270_v8, 264  ;;  %272 = vbcast.lane.b32.xlu0 %v270_v8, 256 }
  0x86   : > { %284 = vbcast.lane.b32.xlu1 %v270_v8, 280  ;;  %280 = vbcast.lane.b32.xlu0 %v270_v8, 272 }
  0x8a   : > { %292 = vbcast.lane.b32.xlu1 %v270_v8, 296  ;;  %288 = vbcast.lane.b32.xlu0 %v270_v8, 288 }
  0x8e   : > { %300 = vbcast.lane.b32.xlu1 %v270_v8, 312  ;;  %296 = vbcast.lane.b32.xlu0 %v270_v8, 304 }
  0x92   : > { %308 = vbcast.lane.b32.xlu1 %v270_v8, 328  ;;  %304 = vbcast.lane.b32.xlu0 %v270_v8, 320 }
  0x96   : > { %316 = vbcast.lane.b32.xlu1 %v270_v8, 344  ;;  %312 = vbcast.lane.b32.xlu0 %v270_v8, 336 }
  0x9a   : > { %324 = vbcast.lane.b32.xlu1 %v270_v8, 360  ;;  %320 = vbcast.lane.b32.xlu0 %v270_v8, 352 }
  0x9e   : > { %332 = vbcast.lane.b32.xlu1 %v270_v8, 376  ;;  %328 = vbcast.lane.b32.xlu0 %v270_v8, 368 }
  0xa2   : > { %343 = vbcast.lane.b32.xlu1 %v337_v10, 264  ;;  %339 = vbcast.lane.b32.xlu0 %v337_v10, 256 }
  0xa6   : > { %351 = vbcast.lane.b32.xlu1 %v337_v10, 280  ;;  %347 = vbcast.lane.b32.xlu0 %v337_v10, 272 }
  0xaa   : > { %359 = vbcast.lane.b32.xlu1 %v337_v10, 296  ;;  %355 = vbcast.lane.b32.xlu0 %v337_v10, 288 }
  0xae   : > { %367 = vbcast.lane.b32.xlu1 %v337_v10, 312  ;;  %363 = vbcast.lane.b32.xlu0 %v337_v10, 304 }
  0xb2   : > { %375 = vbcast.lane.b32.xlu1 %v337_v10, 328  ;;  %371 = vbcast.lane.b32.xlu0 %v337_v10, 320 }
  0xb4   : > { %v4087_v11 = vpop.permute.xlu1 %146  ;;  %v4089_v12 = vpop.permute.xlu0 %138 }
  0xb6   : > { %383 = vbcast.lane.b32.xlu1 %v337_v10, 344  ;;  %379 = vbcast.lane.b32.xlu0 %v337_v10, 336 }
  0xb8   : > { %v4091_v13 = vpop.permute.xlu1 %150  ;;  %v4093_v14 = vpop.permute.xlu0 %142 }
  0xba   : > { %391 = vbcast.lane.b32.xlu1 %v337_v10, 360  ;;  %387 = vbcast.lane.b32.xlu0 %v337_v10, 352 }
  0xbc   : > { %v4096_v16 = vpop.permute.xlu1 %158  ;;  %v4098_v17 = vpop.permute.xlu0 %154 }
  0xbd   : > { %5452 = vst [vmem:[#allocation8_spill] sm:$0xff] %v4096_v16 }
  0xbe   : > { %399 = vbcast.lane.b32.xlu1 %v337_v10, 376  ;;  %395 = vbcast.lane.b32.xlu0 %v337_v10, 368  ;;  %v673_v10 = vunpack.c.0.s8 %v672_v6 }
  0xc0   : > { %v4101_v19 = vpop.permute.xlu1 %166  ;;  %v4103_v20 = vpop.permute.xlu0 %162  ;;  %v4208_v5 = vsub.s32 %v673_v10, %v4075_v1 }
  0xc1   : > { %5453 = vst [vmem:[#allocation9_spill] sm:$0xff] %v4101_v19  ;;  %5454 = vst [vmem:[#allocation10_spill] sm:$0xff] %v4103_v20 }
  0xc2   : > { %410 = vbcast.lane.b32.xlu1 %v404_v18, 264  ;;  %406 = vbcast.lane.b32.xlu0 %v404_v18, 256 }
  0xc4   : > { %v4105_v21 = vpop.permute.xlu1 %174  ;;  %v4107_v22 = vpop.permute.xlu0 %170 }
  0xc5   : > { %5455 = vst [vmem:[#allocation11_spill] sm:$0xff] %v4105_v21  ;;  %5456 = vst [vmem:[#allocation12_spill] sm:$0xff] %v4107_v22 }
  0xc6   : > { %418 = vbcast.lane.b32.xlu1 %v404_v18, 280  ;;  %414 = vbcast.lane.b32.xlu0 %v404_v18, 272 }
  0xc8   : > { %v4109_v23 = vpop.permute.xlu1 %182  ;;  %v4111_v24 = vpop.permute.xlu0 %178 }
  0xc9   : > { %5457 = vst [vmem:[#allocation13_spill] sm:$0xff] %v4109_v23  ;;  %5458 = vst [vmem:[#allocation14_spill] sm:$0xff] %v4111_v24 }
  0xca   : > { %426 = vbcast.lane.b32.xlu1 %v404_v18, 296  ;;  %422 = vbcast.lane.b32.xlu0 %v404_v18, 288 }
  0xcc   : > { %v4113_v25 = vpop.permute.xlu1 %190  ;;  %v4115_v26 = vpop.permute.xlu0 %186 }
  0xcd   : > { %5459 = vst [vmem:[#allocation15_spill] sm:$0xff] %v4113_v25  ;;  %5460 = vst [vmem:[#allocation16_spill] sm:$0xff] %v4115_v26 }
  0xce   : > { %434 = vbcast.lane.b32.xlu1 %v404_v18, 312  ;;  %430 = vbcast.lane.b32.xlu0 %v404_v18, 304 }
  0xd0   : > { %v4117_v27 = vpop.permute.xlu1 %198  ;;  %v4119_v28 = vpop.permute.xlu0 %194 }
  0xd1   : > { %5461 = vst [vmem:[#allocation17_spill] sm:$0xff] %v4117_v27  ;;  %5462 = vst [vmem:[#allocation18_spill] sm:$0xff] %v4119_v28 }
  0xd2   : > { %442 = vbcast.lane.b32.xlu1 %v404_v18, 328  ;;  %438 = vbcast.lane.b32.xlu0 %v404_v18, 320 }
  0xd4   : > { %v4121_v29 = vpop.permute.xlu1 %209  ;;  %v4123_v30 = vpop.permute.xlu0 %205 }
  0xd6   : > { %450 = vbcast.lane.b32.xlu1 %v404_v18, 344  ;;  %446 = vbcast.lane.b32.xlu0 %v404_v18, 336 }
  0xd8   : > { %v4125_v31 = vpop.permute.xlu1 %217  ;;  %v4127_v32 = vpop.permute.xlu0 %213 }
  0xda   : > { %458 = vbcast.lane.b32.xlu1 %v404_v18, 360  ;;  %454 = vbcast.lane.b32.xlu0 %v404_v18, 352 }
  0xdc   : > { %v4130_v34 = vpop.permute.xlu1 %225  ;;  %v4132_v35 = vpop.permute.xlu0 %221 }
  0xdd   : > { %5463 = vst [vmem:[#allocation19_spill] sm:$0xff] %v4130_v34 }
  0xde   : > { %466 = vbcast.lane.b32.xlu1 %v404_v18, 376  ;;  %462 = vbcast.lane.b32.xlu0 %v404_v18, 368 }
  0xe0   : > { %v4135_v37 = vpop.permute.xlu1 %233  ;;  %v4137_v38 = vpop.permute.xlu0 %229 }
  0xe1   : > { %5464 = vst [vmem:[#allocation20_spill] sm:$0xff] %v4135_v37  ;;  %5465 = vst [vmem:[#allocation21_spill] sm:$0xff] %v4137_v38 }
  0xe2   : > { %477 = vbcast.lane.b32.xlu1 %v471_v36, 264  ;;  %473 = vbcast.lane.b32.xlu0 %v471_v36, 256 }
  0xe4   : > { %v4139_v39 = vpop.permute.xlu1 %241  ;;  %v4141_v40 = vpop.permute.xlu0 %237 }
  0xe5   : > { %5466 = vst [vmem:[#allocation22_spill] sm:$0xff] %v4139_v39 }
  0xe6   : > { %485 = vbcast.lane.b32.xlu1 %v471_v36, 280  ;;  %481 = vbcast.lane.b32.xlu0 %v471_v36, 272 }
  0xe8   : > { %v4143_v41 = vpop.permute.xlu1 %249  ;;  %v4145_v42 = vpop.permute.xlu0 %245 }
  0xe9   : > { %5467 = vst [vmem:[#allocation23_spill] sm:$0xff] %v4143_v41  ;;  %5468 = vst [vmem:[#allocation24_spill] sm:$0xff] %v4145_v42 }
  0xea   : > { %493 = vbcast.lane.b32.xlu1 %v471_v36, 296  ;;  %489 = vbcast.lane.b32.xlu0 %v471_v36, 288 }
  0xec   : > { %v4147_v43 = vpop.permute.xlu1 %257  ;;  %v4149_v44 = vpop.permute.xlu0 %253 }
  0xed   : > { %5469 = vst [vmem:[#allocation25_spill] sm:$0xff] %v4147_v43  ;;  %5470 = vst [vmem:[#allocation26_spill] sm:$0xff] %v4149_v44 }
  0xee   : > { %501 = vbcast.lane.b32.xlu1 %v471_v36, 312  ;;  %497 = vbcast.lane.b32.xlu0 %v471_v36, 304 }
  0xf0   : > { %v4151_v45 = vpop.permute.xlu1 %265  ;;  %v4153_v46 = vpop.permute.xlu0 %261 }
  0xf1   : > { %5471 = vst [vmem:[#allocation27_spill] sm:$0xff] %v4151_v45  ;;  %5472 = vst [vmem:[#allocation28_spill] sm:$0xff] %v4153_v46 }
  0xf2   : > { %509 = vbcast.lane.b32.xlu1 %v471_v36, 328  ;;  %505 = vbcast.lane.b32.xlu0 %v471_v36, 320 }
  0xf4   : > { %v4155_v47 = vpop.permute.xlu1 %276  ;;  %v4157_v48 = vpop.permute.xlu0 %272 }
  0xf6   : > { %517 = vbcast.lane.b32.xlu1 %v471_v36, 344  ;;  %513 = vbcast.lane.b32.xlu0 %v471_v36, 336 }
  0xf8   : > { %v4159_v49 = vpop.permute.xlu1 %284  ;;  %v4161_v50 = vpop.permute.xlu0 %280 }
  0xfa   : > { %525 = vbcast.lane.b32.xlu1 %v471_v36, 360  ;;  %521 = vbcast.lane.b32.xlu0 %v471_v36, 352 }
  0xfc   : > { %v4164_v52 = vpop.permute.xlu1 %292  ;;  %v4166_v53 = vpop.permute.xlu0 %288 }
  0xfd   : > { %5473 = vst [vmem:[#allocation29_spill] sm:$0xff] %v4164_v52  ;;  %v1349_v33 = vcombine.low %v4096_v16, %v4164_v52 }
  0xfe   : > { %533 = vbcast.lane.b32.xlu1 %v471_v36, 376  ;;  %529 = vbcast.lane.b32.xlu0 %v471_v36, 368 }
 0x100   : > { %v4169_v55 = vpop.permute.xlu1 %300  ;;  %v4171_v56 = vpop.permute.xlu0 %296 }
 0x101   : > { %5474 = vst [vmem:[#allocation30_spill] sm:$0xff] %v4169_v55  ;;  %5475 = vst [vmem:[#allocation31_spill] sm:$0xff] %v4171_v56 }
 0x102   : > { %544 = vbcast.lane.b32.xlu1 %v538_v54, 264  ;;  %540 = vbcast.lane.b32.xlu0 %v538_v54, 256 }
 0x104   : > { %v4173_v57 = vpop.permute.xlu1 %308  ;;  %v4175_v58 = vpop.permute.xlu0 %304 }
 0x105   : > { %5476 = vst [vmem:[#allocation32_spill] sm:$0xff] %v4173_v57  ;;  %v669_v57 = vcombine.low %v4089_v12, %v4157_v48 }
 0x106   : > { %552 = vbcast.lane.b32.xlu1 %v538_v54, 280  ;;  %548 = vbcast.lane.b32.xlu0 %v538_v54, 272 }
 0x108   : > { %v4177_v59 = vpop.permute.xlu1 %316  ;;  %v4179_v60 = vpop.permute.xlu0 %312 }
 0x109   : > { %5477 = vst [vmem:[#allocation33_spill] sm:$0xff] %v4177_v59  ;;  %5478 = vst [vmem:[#allocation34_spill] sm:$0xff] %v4179_v60 }
 0x10a   : > { %560 = vbcast.lane.b32.xlu1 %v538_v54, 296  ;;  %556 = vbcast.lane.b32.xlu0 %v538_v54, 288 }
 0x10c   : > { %v4181_v61 = vpop.permute.xlu1 %324  ;;  %v4183_v62 = vpop.permute.xlu0 %320 }
 0x10d   : > { %5479 = vst [vmem:[#allocation35_spill] sm:$0xff] %v4181_v61  ;;  %5480 = vst [vmem:[#allocation36_spill] sm:$0xff] %v4183_v62 }
 0x10e   : > { %568 = vbcast.lane.b32.xlu1 %v538_v54, 312  ;;  %564 = vbcast.lane.b32.xlu0 %v538_v54, 304 }
 0x110   : > { %v4185_v63 = vpop.permute.xlu1 %332  ;;  %v4187_v0 = vpop.permute.xlu0 %328 }
 0x111   : > { %5481 = vst [vmem:[#allocation37_spill] sm:$0xff] %v4185_v63  ;;  %5482 = vst [vmem:[#allocation38_spill] sm:$0xff] %v4187_v0  ;;  %v4215_v63 = vrot.slane %v1349_v33, %v4208_v5 }
 0x112   : > { %576 = vbcast.lane.b32.xlu1 %v538_v54, 328  ;;  %572 = vbcast.lane.b32.xlu0 %v538_v54, 320 }
 0x113   : > { %5486 = vst [vmem:[#allocation42_spill] sm:$0xff] %v4215_v63 }
 0x114   : > { %v4189_v2 = vpop.permute.xlu1 %343  ;;  %v4191_v4 = vpop.permute.xlu0 %339 }
 0x115   : > { %v685_v21 = vcombine.low %v4123_v30, %v4191_v4 }
 0x116   : > { %584 = vbcast.lane.b32.xlu1 %v538_v54, 344  ;;  %580 = vbcast.lane.b32.xlu0 %v538_v54, 336 }
 0x118   : > { %v4193_v7 = vpop.permute.xlu1 %351  ;;  %v4195_v8 = vpop.permute.xlu0 %347 }
 0x11a   : > { %592 = vbcast.lane.b32.xlu1 %v538_v54, 360  ;;  %588 = vbcast.lane.b32.xlu0 %v538_v54, 352 }
 0x11c   : > { %v4198_v15 = vpop.permute.xlu1 %359  ;;  %v4200_v18 = vpop.permute.xlu0 %355 }
 0x11d   : > { %5483 = vst [vmem:[#allocation39_spill] sm:$0xff] %v4198_v15  ;;  %v1365_v36 = vcombine.low %v4130_v34, %v4198_v15 }
 0x11e   : > { %600 = vbcast.lane.b32.xlu1 %v538_v54, 376  ;;  %596 = vbcast.lane.b32.xlu0 %v538_v54, 368 }
 0x11f   : > { %v4218_v45 = vrot.slane %v1365_v36, %v4208_v5 }
 0x120   : > { %v4210_v27 = vpop.permute.xlu1 %367  ;;  %v4212_v6 = vpop.permute.xlu0 %363 }
 0x121   : > { %5484 = vst [vmem:[#allocation40_spill] sm:$0xff] %v4210_v27  ;;  %5485 = vst [vmem:[#allocation41_spill] sm:$0xff] %v4212_v6 }
 0x122   : > { %5487 = vst [vmem:[#allocation43_spill] sm:$0xff] %v4218_v45  ;;  %611 = vbcast.lane.b32.xlu1 %v605_v51, 264  ;;  %607 = vbcast.lane.b32.xlu0 %v605_v51, 256 }
 0x124   : > { %v4222_v3 = vpop.permute.xlu1 %375  ;;  %v4224_v9 = vpop.permute.xlu0 %371 }
 0x125   : > { %5488 = vst [vmem:[#allocation44_spill] sm:$0xff] %v4222_v3 }
 0x126   : > { %619 = vbcast.lane.b32.xlu1 %v605_v51, 280  ;;  %615 = vbcast.lane.b32.xlu0 %v605_v51, 272 }
 0x128   : > { %v4226_v54 = vpop.permute.xlu1 %383  ;;  %v4228_v10 = vpop.permute.xlu0 %379 }
 0x129   : > { %5489 = vst [vmem:[#allocation45_spill] sm:$0xff] %v4226_v54  ;;  %5490 = vst [vmem:[#allocation46_spill] sm:$0xff] %v4228_v10  ;;  %v3887_v10 = vmov 1934713408  }
 0x12a   : > { %627 = vbcast.lane.b32.xlu1 %v605_v51, 296  ;;  %623 = vbcast.lane.b32.xlu0 %v605_v51, 288 }
 0x12c   : > { %v4230_v33 = vpop.permute.xlu1 %391  ;;  %v4232_v36 = vpop.permute.xlu0 %387 }
 0x12d   : > { %5491 = vst [vmem:[#allocation47_spill] sm:$0xff] %v4230_v33  ;;  %5492 = vst [vmem:[#allocation48_spill] sm:$0xff] %v4232_v36 }
 0x12e   : > { %635 = vbcast.lane.b32.xlu1 %v605_v51, 312  ;;  %631 = vbcast.lane.b32.xlu0 %v605_v51, 304 }
 0x130   : > { %v4234_v19 = vpop.permute.xlu1 %399  ;;  %v4236_v55 = vpop.permute.xlu0 %395 }
 0x131   : > { %5493 = vst [vmem:[#allocation49_spill] sm:$0xff] %v4234_v19  ;;  %5494 = vst [vmem:[#allocation50_spill] sm:$0xff] %v4236_v55 }
 0x132   : > { %643 = vbcast.lane.b32.xlu1 %v605_v51, 328  ;;  %639 = vbcast.lane.b32.xlu0 %v605_v51, 320 }
 0x134   : > { %v4238_v37 = vpop.permute.xlu1 %410  ;;  %v4240_v27 = vpop.permute.xlu0 %406 }
 0x136   : > { %651 = vbcast.lane.b32.xlu1 %v605_v51, 344  ;;  %647 = vbcast.lane.b32.xlu0 %v605_v51, 336 }
 0x138   : > { %v4242_v46 = vpop.permute.xlu1 %418  ;;  %v4244_v38 = vpop.permute.xlu0 %414 }
 0x13a   : > { %659 = vbcast.lane.b32.xlu1 %v605_v51, 360  ;;  %655 = vbcast.lane.b32.xlu0 %v605_v51, 352 }
 0x13c   : > { %v4246_v6 = vpop.permute.xlu1 %426  ;;  %v4248_v28 = vpop.permute.xlu0 %422 }
 0x13d   : > { %5495 = vst [vmem:[#allocation51_spill] sm:$0xff] %v4246_v6 }
 0x13e   : > { %667 = vbcast.lane.b32.xlu1 %v605_v51, 376  ;;  %663 = vbcast.lane.b32.xlu0 %v605_v51, 368 }
 0x140   : > { %v4250_v19 = vpop.permute.xlu1 %434  ;;  %v4252_v55 = vpop.permute.xlu0 %430 }
 0x141   : > { %5496 = vst [vmem:[#allocation52_spill] sm:$0xff] %v4250_v19  ;;  %5497 = vst [vmem:[#allocation53_spill] sm:$0xff] %v4252_v55 }
 0x144   : > { %v4254_v0 = vpop.permute.xlu1 %442  ;;  %v4256_v20 = vpop.permute.xlu0 %438 }
 0x145   : > { %5498 = vst [vmem:[#allocation54_spill] sm:$0xff] %v4254_v0 }
 0x148   : > { %v4258_v56 = vpop.permute.xlu1 %450  ;;  %v4260_v34 = vpop.permute.xlu0 %446 }
 0x149   : > { %5499 = vst [vmem:[#allocation55_spill] sm:$0xff] %v4258_v56  ;;  %5500 = vst [vmem:[#allocation56_spill] sm:$0xff] %v4260_v34 }
 0x14c   : > { %v4262_v15 = vpop.permute.xlu1 %458  ;;  %v4264_v16 = vpop.permute.xlu0 %454 }
 0x14d   : > { %5501 = vst [vmem:[#allocation57_spill] sm:$0xff] %v4262_v15  ;;  %5502 = vst [vmem:[#allocation58_spill] sm:$0xff] %v4264_v16 }
 0x150   : > { %v4266_v52 = vpop.permute.xlu1 %466  ;;  %v4268_v25 = vpop.permute.xlu0 %462 }
 0x151   : > { %5503 = vst [vmem:[#allocation59_spill] sm:$0xff] %v4266_v52  ;;  %5504 = vst [vmem:[#allocation60_spill] sm:$0xff] %v4268_v25 }
 0x154   : > { %v4270_v51 = vpop.permute.xlu1 %477  ;;  %v474_v19 = vpop.permute.xlu0 %473 }
 0x158   : > { %v4272_v55 = vpop.permute.xlu1 %485  ;;  %v4274_v61 = vpop.permute.xlu0 %481 }
 0x15c   : > { %v4276_v43 = vpop.permute.xlu1 %493  ;;  %v4278_v33 = vpop.permute.xlu0 %489 }
 0x15d   : > { %5505 = vst [vmem:[#allocation61_spill] sm:$0xff] %v4276_v43 }
 0x160   : > { %v4280_v26 = vpop.permute.xlu1 %501  ;;  %v4282_v15 = vpop.permute.xlu0 %497 }
 0x161   : > { %5506 = vst [vmem:[#allocation62_spill] sm:$0xff] %v4280_v26  ;;  %5507 = vst [vmem:[#allocation63_spill] sm:$0xff] %v4282_v15 }
 0x164   : > { %v4284_v62 = vpop.permute.xlu1 %509  ;;  %v4286_v52 = vpop.permute.xlu0 %505 }
 0x165   : > { %5508 = vst [vmem:[#allocation64_spill] sm:$0xff] %v4284_v62 }
 0x168   : > { %v4288_v25 = vpop.permute.xlu1 %517  ;;  %v4290_v16 = vpop.permute.xlu0 %513 }
 0x169   : > { %5509 = vst [vmem:[#allocation65_spill] sm:$0xff] %v4288_v25  ;;  %5510 = vst [vmem:[#allocation66_spill] sm:$0xff] %v4290_v16  ;;  %v736_v16 = vunpack.c.l.s4 %v3887_v10  ;;  %v677_v10 = vrot.slane %v669_v57, %v4208_v5  ;;  %v670_v57 = vcombine.high %v4089_v12, %v4157_v48 }
 0x16b   : > { %v737_v0 = vunpack.c.0.s8 %v736_v16  ;;  %v684_v12 = vrot.slane %v670_v57, %v4208_v5 }
 0x16c   : > { %v4292_v44 = vpop.permute.xlu1 %525  ;;  %v4294_v36 = vpop.permute.xlu0 %521 }
 0x16d   : > { %5511 = vst [vmem:[#allocation67_spill] sm:$0xff] %v4292_v44  ;;  %5512 = vst [vmem:[#allocation68_spill] sm:$0xff] %v4294_v36  ;;  %v4340_v3 = vsub.s32 %v737_v0, %v4075_v1 }
 0x170   : > { %v4296_v23 = vpop.permute.xlu1 %533  ;;  %v4298_v59 = vpop.permute.xlu0 %529 }
 0x171   : > { %5513 = vst [vmem:[#allocation69_spill] sm:$0xff] %v4296_v23  ;;  %5514 = vst [vmem:[#allocation70_spill] sm:$0xff] %v4298_v59 }
 0x174   : > { %v4300_v56 = vpop.permute.xlu1 %544  ;;  %v541_v26 = vpop.permute.xlu0 %540 }
 0x175   : > { %v702_v16 = vcombine.high %v4240_v27, %v541_v26 }
 0x178   : > { %v4302_v15 = vpop.permute.xlu1 %552  ;;  %v4304_v41 = vpop.permute.xlu0 %548 }
 0x17c   : > { %v4306_v54 = vpop.permute.xlu1 %560  ;;  %v4308_v25 = vpop.permute.xlu0 %556 }
 0x17d   : > { %5515 = vst [vmem:[#allocation71_spill] sm:$0xff] %v4306_v54 }
 0x180   : > { %v4310_v24 = vpop.permute.xlu1 %568  ;;  %v4312_v44 = vpop.permute.xlu0 %564 }
 0x181   : > { %5516 = vst [vmem:[#allocation72_spill] sm:$0xff] %v4310_v24  ;;  %5517 = vst [vmem:[#allocation73_spill] sm:$0xff] %v4312_v44 }
 0x184   : > { %v4314_v36 = vpop.permute.xlu1 %576  ;;  %v4316_v23 = vpop.permute.xlu0 %572 }
 0x185   : > { %5518 = vst [vmem:[#allocation74_spill] sm:$0xff] %v4314_v36 }
 0x188   : > { %v4318_v59 = vpop.permute.xlu1 %584  ;;  %v4320_v60 = vpop.permute.xlu0 %580 }
 0x189   : > { %5519 = vst [vmem:[#allocation75_spill] sm:$0xff] %v4318_v59  ;;  %5520 = vst [vmem:[#allocation76_spill] sm:$0xff] %v4320_v60  ;;  %v693_v59 = vrot.slane %v685_v21, %v4208_v5  ;;  %v701_v60 = vcombine.low %v4240_v27, %v541_v26  ;;  %v716_v26 = vrot.slane %v702_v16, %v4208_v5 }
 0x18b   : > { %v709_v21 = vrot.slane %v701_v60, %v4208_v5  ;;  %v734_v0 = vcombine.high %v677_v10, %v693_v59 }
 0x18c   : > { %v4322_v34 = vpop.permute.xlu1 %592  ;;  %v4324_v42 = vpop.permute.xlu0 %588 }
 0x18d   : > { %5521 = vst [vmem:[#allocation77_spill] sm:$0xff] %v4322_v34  ;;  %5522 = vst [vmem:[#allocation78_spill] sm:$0xff] %v4324_v42 }
 0x190   : > { %v4328_v24 = vpop.permute.xlu1 %600  ;;  %v4330_v44 = vpop.permute.xlu0 %596 }
 0x191   : > { %5523 = vst [vmem:[#allocation79_spill] sm:$0xff] %v4328_v24  ;;  %5524 = vst [vmem:[#allocation80_spill] sm:$0xff] %v4330_v44  ;;  %v686_v24 = vcombine.high %v4123_v30, %v4191_v4  ;;  %v733_v44 = vcombine.low %v677_v10, %v693_v59  ;;  %v748_v10 = vrot.slane %v734_v0, %v4340_v3 }
 0x193   : > { %v700_v30 = vrot.slane %v686_v24, %v4208_v5  ;;  %v4357_v27 = vrot.slane %v733_v44, %v4340_v3 }
 0x194   : > { %v4336_v34 = vpop.permute.xlu1 %611  ;;  %v608_v42 = vpop.permute.xlu0 %607 }
 0x195   : > { %v717_v36 = vcombine.low %v474_v19, %v608_v42  ;;  %v718_v39 = vcombine.high %v474_v19, %v608_v42  ;;  %5525 = vst [vmem:[#allocation81_spill] sm:$0xff] %v4357_v27 }
 0x197   : > { %v725_v62 = vrot.slane %v717_v36, %v4208_v5  ;;  %v732_v1 = vrot.slane %v718_v39, %v4208_v5  ;;  %v1381_v39 = vcombine.low %v4246_v6, %v4306_v54  ;;  %v749_v36 = vcombine.low %v684_v12, %v700_v30 }
 0x198   : > { %v4347_v45 = vpop.permute.xlu1 %619  ;;  %v4351_v63 = vpop.permute.xlu0 %615 }
 0x199   : > { %v765_v19 = vcombine.low %v709_v21, %v725_v62  ;;  %v766_v42 = vcombine.high %v709_v21, %v725_v62  ;;  %v781_v62 = vcombine.low %v716_v26, %v732_v1  ;;  %v4376_v16 = vrot.slane %v1381_v39, %v4208_v5 }
 0x19a   : > { %v750_v39 = vcombine.high %v684_v12, %v700_v30  ;;  %v837_v30 = vcombine.low %v4238_v37, %v4300_v56 }
 0x19b   : > { %v4360_v60 = vrot.slane %v765_v19, %v4340_v3  ;;  %v780_v59 = vrot.slane %v766_v42, %v4340_v3  ;;  %v782_v19 = vcombine.high %v716_v26, %v732_v1  ;;  %v789_v54 = vrot.slane %v781_v62, %v4340_v3 }
 0x19c   : > { %v4362_v4 = vpop.permute.xlu1 %627  ;;  %v4367_v48 = vpop.permute.xlu0 %623  ;;  %v1773_v42 = vcombine.low %v4141_v40, %v4224_v9  ;;  %v757_v1 = vrot.slane %v749_v36, %v4340_v3  ;;  %v1757_v26 = vcombine.low %v4107_v22, %v4175_v58  ;;  %v821_v62 = vcombine.low %v4121_v29, %v4189_v2 }
 0x19d   : > { %5526 = vst [vmem:[#allocation82_spill] sm:$0xff] %v4360_v60  ;;  %5527 = vst [vmem:[#allocation83_spill] sm:$0xff] %v4362_v4  ;;  %v1397_v44 = vcombine.low %v4276_v43, %v4362_v4  ;;  %v799_v6 = vcombine.low %v748_v10, %v780_v59  ;;  %v798_v24 = vcombine.high %v4357_v27, %v4360_v60 }
 0x19e   : > { %v801_v12 = vcombine.low %v757_v1, %v789_v54  ;;  %v800_v0 = vcombine.high %v748_v10, %v780_v59  ;;  %v4407_v36 = vrot.slane %v1773_v42, %v4208_v5  ;;  %v1789_v43 = vcombine.low %v4256_v20, %v4316_v23 }
 0x19f   : > { %v4379_v21 = vrot.slane %v1397_v44, %v4208_v5  ;;  %v853_v44 = vcombine.low %v4270_v51, %v4336_v34  ;;  %2850 = vrot.lane.b32.xlu1 %v799_v6, %s3888_s17  ;;  %2846 = vrot.lane.b32.xlu0 %v798_v24, %s3889_s25  ;;  %v796_v6 = vrot.slane %v782_v19, %v4340_v3 }
 0x1a0   : > { %v4381_v57 = vpop.permute.xlu0 %631  ;;  %v805_v24 = vcombine.low %v4093_v14, %v4155_v47  ;;  %v764_v59 = vrot.slane %v750_v39, %v4340_v3  ;;  %v4416_v10 = vrot.slane %v1757_v26, %v4208_v5  ;;  %v829_v19 = vrot.slane %v821_v62, %v4208_v5 }
 0x1a1   : > { %5528 = vst [vmem:[#allocation84_spill] sm:$0xff] %v4381_v57  ;;  %v861_v4 = vrot.slane %v853_v44, %v4208_v5  ;;  %v845_v60 = vrot.slane %v837_v30, %v4208_v5  ;;  %v4431_v26 = vrot.slane %v1789_v43, %v4208_v5  ;;  %v802_v30 = vcombine.high %v757_v1, %v789_v54 }
 0x1a2   : > { %v803_v27 = vcombine.low %v764_v59, %v796_v6  ;;  %v813_v44 = vrot.slane %v805_v24, %v4208_v5  ;;  %v854_v24 = vcombine.high %v4270_v51, %v4336_v34 }
 0x1a3   : > { %2858 = vrot.lane.b32.xlu1 %v801_v12, %s3890_s26  ;;  %2854 = vrot.lane.b32.xlu0 %v800_v0, %s3891_s27  ;;  %v822_v12 = vcombine.high %v4121_v29, %v4189_v2  ;;  %v1821_v0 = vcombine.low %v4416_v10, %v4407_v36  ;;  %v901_v62 = vcombine.low %v845_v60, %v861_v4 }
 0x1a4   : > { %v4401_v57 = vpop.permute.xlu0 %639  ;;  %v869_v22 = vcombine.low %v813_v44, %v829_v19  ;;  %v806_v29 = vcombine.high %v4093_v14, %v4155_v47  ;;  %v804_v47 = vcombine.high %v764_v59, %v796_v6  ;;  %v870_v51 = vcombine.high %v813_v44, %v829_v19 }
 0x1a5   : > { %v1805_v42 = vcombine.low %v4286_v52, %v4401_v57  ;;  %v836_v43 = vrot.slane %v822_v12, %v4208_v5  ;;  %v4445_v54 = vrot.slane %v1821_v0, %v4340_v3  ;;  %v909_v14 = vrot.slane %v901_v62, %v4340_v3 }
 0x1a6   : > { %v868_v1 = vrot.slane %v854_v24, %v4208_v5  ;;  %v820_v12 = vrot.slane %v806_v29, %v4208_v5  ;;  %v973_v19 = vcombine.low %v4244_v38, %v4304_v41  ;;  %v884_v0 = vrot.slane %v870_v51, %v4340_v3 }
 0x1a7   : > { %v4428_v39 = vrot.slane %v1805_v42, %v4208_v5  ;;  %2866 = vrot.lane.b32.xlu1 %v803_v27, %s3892_s28  ;;  %2862 = vrot.lane.b32.xlu0 %v802_v30, %s3893_s29  ;;  %v838_v42 = vcombine.high %v4238_v37, %v4300_v56  ;;  %v902_v27 = vcombine.high %v845_v60, %v861_v4 }
 0x1a8   : > { %v877_v30 = vrot.slane %v869_v22, %v4340_v3  ;;  %v989_v60 = vcombine.low %v4274_v61, %v4351_v63  ;;  %v885_v6 = vcombine.low %v820_v12, %v836_v43  ;;  %v957_v22 = vcombine.low %v4127_v32, %v4195_v8 }
 0x1a9   : > { %v1853_v2 = vcombine.low %v4431_v26, %v4428_v39  ;;  %v852_v56 = vrot.slane %v838_v42, %v4208_v5  ;;  %v916_v59 = vrot.slane %v902_v27, %v4340_v3  ;;  %v941_v62 = vcombine.low %v4087_v11, %v4161_v50 }
 0x1aa   : > { %v933_v4 = vcombine.low %v877_v30, %v909_v14  ;;  %v934_v24 = vcombine.high %v877_v30, %v909_v14  ;;  %v886_v27 = vcombine.high %v820_v12, %v836_v43  ;;  %v981_v37 = vrot.slane %v973_v19, %v4208_v5 }
 0x1ab   : > { %v4448_v34 = vrot.slane %v1853_v2, %v4340_v3  ;;  %2870 = vrot.lane.b32.xlu0 %v804_v47, %s3894_s30  ;;  %v917_v44 = vcombine.low %v852_v56, %v868_v1  ;;  %v918_v29 = vcombine.high %v852_v56, %v868_v1  ;;  %v997_v2 = vrot.slane %v989_v60, %v4208_v5 }
 0x1ac   : > { %2874 = vrot.lane.b32.xlu1 %v933_v4, %s3895_s2  ;;  %v935_v42 = vcombine.low %v884_v0, %v916_v59  ;;  %v965_v47 = vrot.slane %v957_v22, %v4208_v5  ;;  %v893_v51 = vrot.slane %v885_v6, %v4340_v3  ;;  %v949_v14 = vrot.slane %v941_v62, %v4208_v5 }
 0x1ad   : > { %v925_v4 = vrot.slane %v917_v44, %v4340_v3  ;;  %v936_v1 = vcombine.high %v884_v0, %v916_v59  ;;  %v990_v43 = vcombine.high %v4274_v61, %v4351_v63  ;;  %v1037_v30 = vcombine.low %v981_v37, %v997_v2 }
 0x1ae   : > { %v932_v56 = vrot.slane %v918_v29, %v4340_v3  ;;  %v958_v60 = vcombine.high %v4127_v32, %v4195_v8  ;;  %v1005_v22 = vcombine.low %v949_v14, %v965_v47  ;;  %v974_v6 = vcombine.high %v4244_v38, %v4304_v41 }
 0x1af   : > { %2878 = vrot.lane.b32.xlu0 %v934_v24, %s3896_s3  ;;  %v937_v12 = vcombine.low %v893_v51, %v925_v4  ;;  %v900_v59 = vrot.slane %v886_v27, %v4340_v3  ;;  %v942_v61 = vcombine.high %v4087_v11, %v4161_v50  ;;  %v938_v63 = vcombine.high %v893_v51, %v925_v4 }
 0x1b0   : > { %2882 = vrot.lane.b32.xlu1 %v935_v42, %s3897_s4  ;;  %v1004_v19 = vrot.slane %v990_v43, %v4208_v5  ;;  %v1038_v44 = vcombine.high %v981_v37, %v997_v2  ;;  %v1045_v62 = vrot.slane %v1037_v30, %v4340_v3  ;;  %v972_v32 = vrot.slane %v958_v60, %v4208_v5 }
 0x1b1   : > { %v939_v0 = vcombine.low %v900_v59, %v932_v56  ;;  %v1006_v38 = vcombine.high %v949_v14, %v965_v47  ;;  %v988_v41 = vrot.slane %v974_v6, %v4208_v5  ;;  %v1013_v11 = vrot.slane %v1005_v22, %v4340_v3 }
 0x1b2   : > { %v956_v50 = vrot.slane %v942_v61, %v4208_v5  ;;  %v940_v8 = vcombine.high %v900_v59, %v932_v56  ;;  %v1125_v37 = vcombine.low %v4272_v55, %v4347_v45  ;;  %v1052_v2 = vrot.slane %v1038_v44, %v4340_v3 }
 0x1b3   : > { %2886 = vrot.lane.b32.xlu0 %v936_v1, %s3898_s5  ;;  %v1053_v24 = vcombine.low %v988_v41, %v1004_v19  ;;  %v1069_v29 = vcombine.low %v1013_v11, %v1045_v62  ;;  %v1093_v42 = vcombine.low %v4125_v31, %v4193_v7  ;;  %v1109_v47 = vcombine.low %v4242_v46, %v4302_v15 }
 0x1b4   : > { %2890 = vrot.lane.b32.xlu1 %v937_v12, %s3899_s11  ;;  %v1021_v27 = vcombine.low %v956_v50, %v972_v32  ;;  %v1020_v51 = vrot.slane %v1006_v38, %v4340_v3  ;;  %v1077_v4 = vcombine.low %v4091_v13, %v4159_v49  ;;  %v1070_v14 = vcombine.high %v1013_v11, %v1045_v62 }
 0x1b5   : > { %v1133_v1 = vrot.slane %v1125_v37, %v4208_v5  ;;  %v1054_v43 = vcombine.high %v988_v41, %v1004_v19  ;;  %v1061_v12 = vrot.slane %v1053_v24, %v4340_v3  ;;  %v1101_v56 = vrot.slane %v1093_v42, %v4208_v5 }
 0x1b6   : > { %v1071_v30 = vcombine.low %v1020_v51, %v1052_v2  ;;  %v1022_v60 = vcombine.high %v956_v50, %v972_v32  ;;  %v1117_v22 = vrot.slane %v1109_v47, %v4208_v5  ;;  %v1029_v6 = vrot.slane %v1021_v27, %v4340_v3 }
 0x1b7   : > { %2894 = vrot.lane.b32.xlu0 %v938_v63, %s3900_s13  ;;  %v1085_v59 = vrot.slane %v1077_v4, %v4208_v5  ;;  %v1072_v61 = vcombine.high %v1020_v51, %v1052_v2  ;;  %v1126_v63 = vcombine.high %v4272_v55, %v4347_v45  ;;  %v1094_v62 = vcombine.high %v4125_v31, %v4193_v7 }
 0x1b8   : > { %2898 = vrot.lane.b32.xlu1 %v939_v0, %s3901_s14  ;;  %v1173_v19 = vcombine.low %v1117_v22, %v1133_v1  ;;  %v1073_v44 = vcombine.low %v1029_v6, %v1061_v12  ;;  %v1068_v0 = vrot.slane %v1054_v43, %v4340_v3  ;;  %v1110_v38 = vcombine.high %v4242_v46, %v4302_v15 }
 0x1b9   : > { %v1141_v32 = vcombine.low %v1085_v59, %v1101_v56  ;;  %v1036_v41 = vrot.slane %v1022_v60, %v4340_v3  ;;  %v1078_v45 = vcombine.high %v4091_v13, %v4159_v49  ;;  %v1074_v55 = vcombine.high %v1029_v6, %v1061_v12 }
 0x1ba   : > { %v1140_v11 = vrot.slane %v1126_v63, %v4208_v5  ;;  %v1174_v50 = vcombine.high %v1117_v22, %v1133_v1  ;;  %v1181_v37 = vrot.slane %v1173_v19, %v4340_v3  ;;  %v1108_v31 = vrot.slane %v1094_v62, %v4208_v5 }
 0x1bb   : > { %2902 = vrot.lane.b32.xlu0 %v940_v8, %s3902_s16  ;;  %v1075_v8 = vcombine.low %v1036_v41, %v1068_v0  ;;  %v1142_v46 = vcombine.high %v1085_v59, %v1101_v56  ;;  %v1124_v7 = vrot.slane %v1110_v38, %v4208_v5  ;;  %v1149_v13 = vrot.slane %v1141_v32, %v4340_v3  ;;  %v5529_v32 = vld [vmem:[#allocation42_spill] sm:$0xff]  ;;  %v5530_v38 = vld [vmem:[#allocation43_spill] sm:$0xff] }
 0x1bc   : > { %2906 = vrot.lane.b32.xlu1 %v1069_v29, %s5410_s20  ;;  %v1092_v49 = vrot.slane %v1078_v45, %v4208_v5  ;;  %v1076_v15 = vcombine.high %v1036_v41, %v1068_v0  ;;  %v1261_v29 = vcombine.low %v4278_v33, %v4367_v48  ;;  %v1188_v42 = vrot.slane %v1174_v50, %v4340_v3  ;;  %s3921_s20 = smov 68  }
 0x1bd   : > { %v1189_v24 = vcombine.low %v1124_v7, %v1140_v11  ;;  %v1205_v2 = vcombine.low %v1149_v13, %v1181_v37  ;;  %v1229_v47 = vcombine.low %v4132_v35, %v4200_v18  ;;  %v1245_v51 = vcombine.low %v4248_v28, %v4308_v25 }
 0x1be   : > { %v1157_v27 = vcombine.low %v1092_v49, %v1108_v31  ;;  %v1156_v4 = vrot.slane %v1142_v46, %v4340_v3  ;;  %v1206_v1 = vcombine.high %v1149_v13, %v1181_v37  ;;  %v1190_v43 = vcombine.high %v1124_v7, %v1140_v11 }
 0x1bf   : > { %2910 = vrot.lane.b32.xlu0 %v1070_v14, %s5407_s22  ;;  %v1213_v14 = vcombine.low %v4098_v17, %v4166_v53  ;;  %v1197_v56 = vrot.slane %v1189_v24, %v4340_v3  ;;  %v1158_v60 = vcombine.high %v1092_v49, %v1108_v31  ;;  %v1237_v22 = vrot.slane %v1229_v47, %v4208_v5  ;;  %s3918_s22 = smov 62  }
 0x1c0   : > { %2914 = vrot.lane.b32.xlu1 %v1071_v30, %s5396_s23  ;;  %s5398_s23 = smov 40   ;;  %v1269_v30 = vrot.slane %v1261_v29, %v4208_v5  ;;  %v1207_v12 = vcombine.low %v1156_v4, %v1188_v42  ;;  %v1253_v6 = vrot.slane %v1245_v51, %v4208_v5  ;;  %v1165_v59 = vrot.slane %v1157_v27, %v4340_v3 }
 0x1c1   : > { %v1208_v63 = vcombine.high %v1156_v4, %v1188_v42  ;;  %v1262_v19 = vcombine.high %v4278_v33, %v4367_v48  ;;  %v1204_v62 = vrot.slane %v1190_v43, %v4340_v3  ;;  %v5531_v41 = vcombine.high %v5529_v32, %v5530_v38 }
 0x1c2   : > { %v1209_v0 = vcombine.low %v1165_v59, %v1197_v56  ;;  %v1230_v33 = vcombine.high %v4132_v35, %v4200_v18  ;;  %v1246_v50 = vcombine.high %v4248_v28, %v4308_v25  ;;  %v1214_v37 = vcombine.high %v4098_v17, %v4166_v53 }
 0x1c3   : > { %2918 = vrot.lane.b32.xlu0 %v1072_v61, %s5397_s24  ;;  %s5399_s24 = smov 42   ;;  %v1221_v61 = vrot.slane %v1213_v14, %v4208_v5  ;;  %v4565_v45 = vrot.slane %v5531_v41, %v4340_v3  ;;  %v1210_v31 = vcombine.high %v1165_v59, %v1197_v56  ;;  %v1276_v35 = vrot.slane %v1262_v19, %v4208_v5  ;;  %v4607_v59 = vpop.permute.xlu1 %635 }
 0x1c4   : > { %2922 = vrot.lane.b32.xlu1 %v1073_v44, %s5398_s23  ;;  %s5400_s23 = smov 44   ;;  %v1309_v44 = vcombine.low %v1253_v6, %v1269_v30  ;;  %v1310_v18 = vcombine.high %v1253_v6, %v1269_v30  ;;  %v1244_v28 = vrot.slane %v1230_v33, %v4208_v5  ;;  %v1260_v17 = vrot.slane %v1246_v50, %v4208_v5  ;;  %v5534_v33 = vld [vmem:[#allocation64_spill] sm:$0xff] }
 0x1c5   : > { %v1277_v48 = vcombine.low %v1221_v61, %v1237_v22  ;;  %v1278_v49 = vcombine.high %v1221_v61, %v1237_v22  ;;  %v1228_v24 = vrot.slane %v1214_v37, %v4208_v5  ;;  %v1445_v56 = vcombine.low %v4376_v16, %v4379_v21 }
 0x1c6   : > { %v1317_v25 = vrot.slane %v1309_v44, %v4340_v3  ;;  %v1325_v29 = vcombine.low %v1260_v17, %v1276_v35  ;;  %v1324_v42 = vrot.slane %v1310_v18, %v4340_v3  ;;  %v1326_v4 = vcombine.high %v1260_v17, %v1276_v35  ;;  %v5537_v35 = vld [vmem:[#allocation74_spill] sm:$0xff] }
 0x1c7   : > { %2926 = vrot.lane.b32.xlu0 %v1074_v55, %s5399_s24  ;;  %s5401_s24 = smov 46   ;;  %v5532_v55 = vcombine.high %v4376_v16, %v4379_v21  ;;  %v1285_v53 = vrot.slane %v1277_v48, %v4340_v3  ;;  %v1293_v27 = vcombine.low %v1228_v24, %v1244_v28  ;;  %v1292_v47 = vrot.slane %v1278_v49, %v4340_v3  ;;  %v5538_v18 = vld [vmem:[#allocation54_spill] sm:$0xff]  ;;  %v5540_v49 = vld [vmem:[#allocation11_spill] sm:$0xff] }
 0x1c8   : > { %2930 = vrot.lane.b32.xlu1 %v1075_v8, %s5400_s23  ;;  %s5402_s23 = smov 48   ;;  %v1172_v8 = vrot.slane %v1158_v60, %v4340_v3  ;;  %v1294_v43 = vcombine.high %v1228_v24, %v1244_v28  ;;  %v1340_v22 = vrot.slane %v1326_v4, %v4340_v3  ;;  %v1413_v6 = vcombine.low %v5529_v32, %v5530_v38  ;;  %v5539_v28 = vld [vmem:[#allocation32_spill] sm:$0xff] }
 0x1c9   : > { %v4571_v11 = vrot.slane %v5532_v55, %v4340_v3  ;;  %v1342_v51 = vcombine.high %v1285_v53, %v1317_v25  ;;  %v1343_v14 = vcombine.low %v1292_v47, %v1324_v42  ;;  %v1301_v30 = vrot.slane %v1293_v27, %v4340_v3 }
 0x1ca   : > { %v1211_v13 = vcombine.low %v1172_v8, %v1204_v62  ;;  %v1308_v61 = vrot.slane %v1294_v43, %v4340_v3  ;;  %v1453_v19 = vrot.slane %v1445_v56, %v4340_v3  ;;  %v1774_v44 = vcombine.high %v4141_v40, %v4224_v9  ;;  %v644_v9 = vpop.permute.xlu1 %643 }
 0x1cb   : > { %2934 = vrot.lane.b32.xlu0 %v1076_v15, %s5401_s24  ;;  %s5403_s24 = smov 50   ;;  %v1479_v46 = vcombine.low %v4565_v45, %v4571_v11  ;;  %v1480_v7 = vcombine.high %v4565_v45, %v4571_v11  ;;  %v1212_v15 = vcombine.high %v1172_v8, %v1204_v62  ;;  %v5533_v62 = vld [vmem:[#allocation12_spill] sm:$0xff]  ;;  %v1854_v38 = vcombine.high %v4431_v26, %v4428_v39  ;;  %v5608_v45 = vld [vmem:[#allocation70_spill] sm:$0xff] }
 0x1cc   : > { %2938 = vrot.lane.b32.xlu1 %v1205_v2, %s5402_s23  ;;  %s5405_s23 = smov 52   ;;  %v1341_v2 = vcombine.low %v1285_v53, %v1317_v25  ;;  %v1347_v21 = vcombine.low %v1308_v61, %v1340_v22  ;;  %v1758_v32 = vcombine.high %v5533_v62, %v4175_v58  ;;  %v1348_v40 = vcombine.high %v1308_v61, %v1340_v22 }
 0x1cd   : > { %v1941_v39 = vcombine.low %v5534_v33, %v644_v9  ;;  %v1868_v50 = vrot.slane %v1854_v38, %v4340_v3  ;;  %v1886_v8 = vcombine.high %v4445_v54, %v4448_v34  ;;  %v1893_v17 = vcombine.low %v5540_v49, %v5539_v28 }
 0x1ce   : > { %v1772_v55 = vrot.slane %v1758_v32, %v4208_v5  ;;  %v1926_v22 = vcombine.high %v5538_v18, %v5537_v35  ;;  %v1894_v61 = vcombine.high %v5540_v49, %v5539_v28 }
 0x1cf   : > { %2942 = vrot.lane.b32.xlu0 %v1206_v1, %s5403_s24  ;;  %s5404_s24 = smov 54   ;;  %v1333_v1 = vrot.slane %v1325_v29, %v4340_v3  ;;  %v1949_v53 = vrot.slane %v1941_v39, %v4208_v5  ;;  %v1901_v4 = vrot.slane %v1893_v17, %v4208_v5  ;;  %v5542_v39 = vld [vmem:[#allocation46_spill] sm:$0xff] }
 0x1d0   : > { %2946 = vrot.lane.b32.xlu1 %v1207_v12, %s5405_s23  ;;  %s5408_s23 = smov 58   ;;  %v1344_v12 = vcombine.high %v1292_v47, %v1324_v42  ;;  %v1908_v38 = vrot.slane %v1894_v61, %v4208_v5 }
 0x1d1   : > { %v1345_v60 = vcombine.low %v1301_v30, %v1333_v1  ;;  %v1346_v16 = vcombine.high %v1301_v30, %v1333_v1 }
 0x1d3   : > { %2950 = vrot.lane.b32.xlu0 %v1208_v63, %s5404_s24  ;;  %s5406_s24 = smov 56   ;;  %v1806_v63 = vcombine.high %v4286_v52, %v4401_v57  ;;  %v1421_v52 = vrot.slane %v1413_v6, %v4340_v3 }
 0x1d4   : > { %2954 = vrot.lane.b32.xlu1 %v1209_v0, %s5406_s24  ;;  %s5409_s24 = smov 60   ;;  %v1790_v0 = vcombine.high %v4256_v20, %v4316_v23  ;;  %v1788_v20 = vrot.slane %v1774_v44, %v4208_v5  ;;  %v1822_v23 = vcombine.high %v4416_v10, %v4407_v36  ;;  %v5535_v36 = vld [vmem:[#allocation44_spill] sm:$0xff]  ;;  %v5536_v10 = vld [vmem:[#allocation22_spill] sm:$0xff]  ;;  %v648_v44 = vpop.permute.xlu0 %647 }
 0x1d5   : > { %v1820_v57 = vrot.slane %v1806_v63, %v4208_v5  ;;  %v1477_v41 = vcombine.low %v1421_v52, %v1453_v19  ;;  %v1478_v48 = vcombine.high %v1421_v52, %v1453_v19  ;;  %v1909_v37 = vcombine.low %v5536_v10, %v5535_v36 }
 0x1d6   : > { %v1804_v58 = vrot.slane %v1790_v0, %v4208_v5  ;;  %v1836_v25 = vrot.slane %v1822_v23, %v4340_v3  ;;  %v1838_v27 = vcombine.high %v1772_v55, %v1788_v20  ;;  %v1910_v56 = vcombine.high %v5536_v10, %v5535_v36 }
 0x1d7   : > { %2958 = vrot.lane.b32.xlu0 %v1210_v31, %s5408_s23  ;;  %s5412_s23 = smov 64   ;;  %v1837_v31 = vcombine.low %v1772_v55, %v1788_v20  ;;  %v1917_v42 = vrot.slane %v1909_v37, %v4208_v5  ;;  %v1940_v52 = vrot.slane %v1926_v22, %v4208_v5  ;;  %v5546_v37 = vld [vmem:[#allocation34_spill] sm:$0xff] }
 0x1d8   : > { %2962 = vrot.lane.b32.xlu1 %v1211_v13, %s5409_s24  ;;  %s5414_s24 = smov 66   ;;  %v1869_v26 = vcombine.low %v1804_v58, %v1820_v57  ;;  %v1925_v13 = vcombine.low %v5538_v18, %v5537_v35  ;;  %v1887_v24 = vcombine.low %v1836_v25, %v1868_v50  ;;  %v1852_v6 = vrot.slane %v1838_v27, %v4340_v3 }
 0x1d9   : > { %v1924_v62 = vrot.slane %v1910_v56, %v4208_v5  ;;  %v1958_v32 = vcombine.high %v1901_v4, %v1917_v42 }
 0x1da   : > { %v1877_v29 = vrot.slane %v1869_v26, %v4340_v3  ;;  %v1933_v47 = vrot.slane %v1925_v13, %v4208_v5  ;;  %v5543_v26 = vld [vmem:[#allocation24_spill] sm:$0xff] }
 0x1db   : > { %2966 = vrot.lane.b32.xlu0 %v1212_v15, %s3918_s22  ;;  %v1870_v15 = vcombine.high %v1804_v58, %v1820_v57  ;;  %v1972_v10 = vrot.slane %v1958_v32, %v4340_v3  ;;  %v1974_v17 = vcombine.high %v1908_v38, %v1924_v62 }
 0x1dc   : > { %2970 = vrot.lane.b32.xlu1 %v1341_v2, %s5412_s23  ;;  %s5415_s23 = smov 70   ;;  %v1888_v2 = vcombine.high %v1836_v25, %v1868_v50  ;;  %v1989_v1 = vcombine.low %v1933_v47, %v1949_v53  ;;  %v5544_v50 = vld [vmem:[#allocation76_spill] sm:$0xff] }
 0x1dd   : > { %v1884_v30 = vrot.slane %v1870_v15, %v4340_v3 }
 0x1de   : > { %v1997_v19 = vrot.slane %v1989_v1, %v4340_v3  ;;  %v2046_v1 = vcombine.high %v5543_v26, %v5542_v39 }
 0x1df   : > { %2974 = vrot.lane.b32.xlu0 %v1342_v51, %s5414_s24  ;;  %s5416_s24 = smov 72   ;;  %v1845_v51 = vrot.slane %v1837_v31, %v4340_v3  ;;  %v1892_v0 = vcombine.high %v1852_v6, %v1884_v30  ;;  %v5547_v31 = vld [vmem:[#allocation14_spill] sm:$0xff] }
 0x1e0   : > { %2978 = vrot.lane.b32.xlu1 %v1343_v14, %s3921_s20  ;;  %v1942_v14 = vcombine.high %v5534_v33, %v644_v9  ;;  %v4673_v9 = vpop.permute.xlu1 %651  ;;  %v1973_v33 = vcombine.low %v1908_v38, %v1924_v62  ;;  %v2029_v35 = vcombine.low %v5547_v31, %v5546_v37  ;;  %v2030_v56 = vcombine.high %v5547_v31, %v5546_v37  ;;  %v5555_v37 = vld [vmem:[#allocation13_spill] sm:$0xff] }
 0x1e1   : > { %v1889_v43 = vcombine.low %v1845_v51, %v1877_v29 }
 0x1e2   : > { %v1956_v63 = vrot.slane %v1942_v14, %v4208_v5  ;;  %v2044_v32 = vrot.slane %v2030_v56, %v4208_v5 }
 0x1e3   : > { %2982 = vrot.lane.b32.xlu0 %v1344_v12, %s5415_s23  ;;  %s5417_s23 = smov 74   ;;  %v1890_v12 = vcombine.high %v1845_v51, %v1877_v29  ;;  %v4692_v29 = vpop.permute.xlu0 %655 }
 0x1e4   : > { %2986 = vrot.lane.b32.xlu1 %v1345_v60, %s5416_s24  ;;  %s5418_s24 = smov 76   ;;  %v1957_v60 = vcombine.low %v1901_v4, %v1917_v42  ;;  %v2006_v18 = vcombine.high %v1940_v52, %v1956_v63  ;;  %v2037_v42 = vrot.slane %v2029_v35, %v4208_v5 }
 0x1e6   : > { %v1965_v57 = vrot.slane %v1957_v60, %v4340_v3  ;;  %v2020_v4 = vrot.slane %v2006_v18, %v4340_v3 }
 0x1e7   : > { %2990 = vrot.lane.b32.xlu0 %v1346_v16, %s5417_s23  ;;  %s5419_s23 = smov 78   ;;  %v1990_v16 = vcombine.high %v1933_v47, %v1949_v53  ;;  %v4712_v61 = vpop.permute.xlu0 %663 }
 0x1e8   : > { %2994 = vrot.lane.b32.xlu1 %v1347_v21, %s5418_s24  ;;  %s3927_s24 = smov 80   ;;  %v1891_v21 = vcombine.low %v1852_v6, %v1884_v30  ;;  %v2021_v23 = vcombine.low %v1965_v57, %v1997_v19  ;;  %v2022_v55 = vcombine.high %v1965_v57, %v1997_v19  ;;  %v2060_v19 = vrot.slane %v2046_v1, %v4208_v5 }
 0x1e9   : > { %v2004_v58 = vrot.slane %v1990_v16, %v4340_v3  ;;  %v2621_v11 = vcombine.low %v5608_v45, %v4712_v61 }
 0x1eb   : > { %2998 = vrot.lane.b32.xlu0 %v1348_v40, %s5419_s23  ;;  %s3928_s23 = smov 82   ;;  %v2005_v40 = vcombine.low %v1940_v52, %v1956_v63  ;;  %v2023_v25 = vcombine.low %v1972_v10, %v2004_v58  ;;  %v2024_v49 = vcombine.high %v1972_v10, %v2004_v58  ;;  %v5548_v52 = vld [vmem:[#allocation65_spill] sm:$0xff] }
 0x1ec   : > { %3002 = vrot.lane.b32.xlu1 %v1477_v41, %s3927_s24  ;;  %v5541_v41 = vld [vmem:[#allocation66_spill] sm:$0xff]  ;;  %v2213_v57 = vcombine.low %v5548_v52, %v4673_v9  ;;  %v5549_v58 = vld [vmem:[#allocation45_spill] sm:$0xff]  ;;  %v2214_v1 = vcombine.high %v5548_v52, %v4673_v9 }
 0x1ed   : > { %v2077_v20 = vcombine.low %v5541_v41, %v648_v44  ;;  %v2013_v28 = vrot.slane %v2005_v40, %v4340_v3  ;;  %v2078_v27 = vcombine.high %v5541_v41, %v648_v44  ;;  %v5554_v10 = vld [vmem:[#allocation33_spill] sm:$0xff] }
 0x1ee   : > { %v2165_v31 = vcombine.low %v5555_v37, %v5554_v10  ;;  %v2221_v35 = vrot.slane %v2213_v57, %v4208_v5 }
 0x1ef   : > { %3006 = vrot.lane.b32.xlu0 %v1478_v48, %s3928_s23  ;;  %v2045_v48 = vcombine.low %v5543_v26, %v5542_v39  ;;  %v2085_v13 = vrot.slane %v2077_v20, %v4208_v5  ;;  %v2092_v60 = vrot.slane %v2078_v27, %v4208_v5  ;;  %v2109_v26 = vcombine.low %v2044_v32, %v2060_v19 }
 0x1f0   : > { %3098 = vrot.lane.b32.xlu1 %v1886_v8, %s3889_s25  ;;  %v5545_v8 = vld [vmem:[#allocation56_spill] sm:$0xff]  ;;  %s5556_s25 = smov 34  }
 0x1f1   : > { %v2061_v36 = vcombine.low %v5545_v8, %v5544_v50  ;;  %v2053_v53 = vrot.slane %v2045_v48, %v4208_v5  ;;  %v2062_v30 = vcombine.high %v5545_v8, %v5544_v50  ;;  %v5551_v48 = vld [vmem:[#allocation75_spill] sm:$0xff] }
 0x1f2   : > { %v5552_v50 = vld [vmem:[#allocation55_spill] sm:$0xff] }
 0x1f3   : > { %3102 = vrot.lane.b32.xlu0 %v1887_v24, %s3888_s17  ;;  %v2069_v15 = vrot.slane %v2061_v36, %v4208_v5  ;;  %v4690_v24 = vpop.permute.xlu1 %659  ;;  %v2094_v44 = vcombine.high %v2037_v42, %v2053_v53  ;;  %v2197_v8 = vcombine.low %v5552_v50, %v5551_v48  ;;  %s5553_s17 = smov 32  }
 0x1f4   : > { %3106 = vrot.lane.b32.xlu1 %v1888_v2, %s3891_s27  ;;  %v1981_v2 = vrot.slane %v1973_v33, %v4340_v3  ;;  %s5561_s27 = smov 38  }
 0x1f5   : > { %v2125_v47 = vcombine.low %v2069_v15, %v2085_v13  ;;  %v2126_v22 = vcombine.high %v2069_v15, %v2085_v13  ;;  %v2108_v36 = vrot.slane %v2094_v44, %v4340_v3  ;;  %v2166_v44 = vcombine.high %v5555_v37, %v5554_v10  ;;  %v5567_v37 = vld [vmem:[#allocation48_spill] sm:$0xff] }
 0x1f6   : > { %v2025_v51 = vcombine.low %v1981_v2, %v2013_v28  ;;  %v2026_v14 = vcombine.high %v1981_v2, %v2013_v28 }
 0x1f7   : > { %3110 = vrot.lane.b32.xlu0 %v1889_v43, %s3890_s26  ;;  %v2093_v43 = vcombine.low %v2037_v42, %v2053_v53  ;;  %v4710_v6 = vpop.permute.xlu1 %667  ;;  %v2133_v16 = vrot.slane %v2125_v47, %v4340_v3  ;;  %v5558_v53 = vld [vmem:[#allocation82_spill] sm:$0xff]  ;;  %v2110_v47 = vcombine.high %v2044_v32, %v2060_v19  ;;  %s5560_s26 = smov 36  }
 0x1f8   : > { %3114 = vrot.lane.b32.xlu1 %v1890_v12, %s3893_s29  ;;  %v1988_v12 = vrot.slane %v1974_v17, %v4340_v3  ;;  %v5557_v17 = vld [vmem:[#allocation81_spill] sm:$0xff]  ;;  %s5563_s29 = smov 42  }
 0x1f9   : > { %v2101_v62 = vrot.slane %v2093_v43, %v4340_v3  ;;  %v5559_v15 = vcombine.low %v5557_v17, %v5558_v53  ;;  %v2124_v19 = vrot.slane %v2110_v47, %v4340_v3  ;;  %v5570_v17 = vld [vmem:[#allocation58_spill] sm:$0xff] }
 0x1fa   : > { %v2027_v63 = vcombine.low %v1988_v12, %v2020_v4 }
 0x1fb   : > { %3118 = vrot.lane.b32.xlu0 %v1891_v21, %s3892_s28  ;;  %v2028_v21 = vcombine.high %v1988_v12, %v2020_v4  ;;  %v2157_v40 = vcombine.low %v2101_v62, %v2133_v16  ;;  %v2158_v39 = vcombine.high %v2101_v62, %v2133_v16  ;;  %v2117_v4 = vrot.slane %v2109_v26, %v4340_v3  ;;  %s5562_s28 = smov 40  }
 0x1fc   : > { %3122 = vrot.lane.b32.xlu1 %v1892_v0, %s3894_s30  ;;  %v2076_v0 = vrot.slane %v2062_v30, %v4208_v5  ;;  %s5564_s30 = smov 44  }
 0x1fe   : > { %v2141_v38 = vcombine.low %v2076_v0, %v2092_v60  ;;  %v2142_v18 = vcombine.high %v2076_v0, %v2092_v60  ;;  %v2198_v60 = vcombine.high %v5552_v50, %v5551_v48  ;;  %v2228_v0 = vrot.slane %v2214_v1, %v4208_v5  ;;  %v5566_v48 = vld [vmem:[#allocation68_spill] sm:$0xff] }
 0x1ff   : > { %3126 = vrot.lane.b32.xlu0 %v2021_v23, %s3895_s2  ;;  %v2140_v23 = vrot.slane %v2126_v22, %v4340_v3  ;;  %s5565_s2 = smov 46   ;;  %v2349_v50 = vcombine.low %v5566_v48, %v4692_v29 }
 0x200   : > { %3130 = vrot.lane.b32.xlu1 %v2022_v55, %s3896_s3  ;;  %v5550_v55 = vld [vmem:[#allocation23_spill] sm:$0xff]  ;;  %v2149_v28 = vrot.slane %v2141_v38, %v4340_v3  ;;  %v2156_v56 = vrot.slane %v2142_v18, %v4340_v3  ;;  %s5571_s3 = smov 48  }
 0x201   : > { %v2181_v33 = vcombine.low %v5550_v55, %v5549_v58  ;;  %v2159_v13 = vcombine.low %v2108_v36, %v2140_v23  ;;  %v2160_v42 = vcombine.high %v2108_v36, %v2140_v23  ;;  %v2182_v16 = vcombine.high %v5550_v55, %v5549_v58 }
 0x202   : > { %v2161_v12 = vcombine.low %v2117_v4, %v2149_v28  ;;  %v2163_v57 = vcombine.low %v2124_v19, %v2156_v56 }
 0x203   : > { %3134 = vrot.lane.b32.xlu0 %v2023_v25, %s3897_s4  ;;  %v2196_v23 = vrot.slane %v2182_v16, %v4208_v5  ;;  %s5574_s4 = smov 50  }
 0x204   : > { %3138 = vrot.lane.b32.xlu1 %v2024_v49, %s3898_s5  ;;  %v2189_v49 = vrot.slane %v2181_v33, %v4208_v5  ;;  %s5575_s5 = smov 52  }
 0x207   : > { %3142 = vrot.lane.b32.xlu0 %v2025_v51, %s3899_s11  ;;  %v2205_v51 = vrot.slane %v2197_v8, %v4208_v5  ;;  %s5576_s11 = smov 54  }
 0x208   : > { %3146 = vrot.lane.b32.xlu1 %v2026_v14, %s3900_s13  ;;  %v2173_v14 = vrot.slane %v2165_v31, %v4208_v5  ;;  %v5568_v31 = vld [vmem:[#allocation26_spill] sm:$0xff]  ;;  %s5577_s13 = smov 56  }
 0x209   : > { %v2261_v43 = vcombine.low %v2205_v51, %v2221_v35  ;;  %v2262_v32 = vcombine.high %v2205_v51, %v2221_v35  ;;  %v2317_v35 = vcombine.low %v5568_v31, %v5567_v37  ;;  %v2357_v51 = vrot.slane %v2349_v50, %v4208_v5 }
 0x20a   : > { %v2230_v58 = vcombine.high %v2173_v14, %v2189_v49 }
 0x20b   : > { %3150 = vrot.lane.b32.xlu0 %v2027_v63, %s3901_s14  ;;  %v2162_v63 = vcombine.high %v2117_v4, %v2149_v28  ;;  %v2269_v38 = vrot.slane %v2261_v43, %v4340_v3  ;;  %v2276_v10 = vrot.slane %v2262_v32, %v4340_v3  ;;  %s5578_s14 = smov 58  }
 0x20c   : > { %3154 = vrot.lane.b32.xlu1 %v2028_v21, %s3902_s16  ;;  %v2229_v21 = vcombine.low %v2173_v14, %v2189_v49  ;;  %v5569_v49 = vld [vmem:[#allocation78_spill] sm:$0xff]  ;;  %s5579_s16 = smov 60  }
 0x20d   : > { %v2333_v53 = vcombine.low %v5570_v17, %v5569_v49 }
 0x20e   : > { %v2237_v33 = vrot.slane %v2229_v21, %v4340_v3 }
 0x20f   : > { %3158 = vrot.lane.b32.xlu0 %v2157_v40, %s5553_s17  ;;  %v2212_v40 = vrot.slane %v2198_v60, %v4208_v5 }
 0x210   : > { %3162 = vrot.lane.b32.xlu1 %v2158_v39, %s5556_s25  ;;  %v2180_v39 = vrot.slane %v2166_v44, %v4208_v5  ;;  %v2293_v36 = vcombine.low %v2237_v33, %v2269_v38  ;;  %s5588_s25 = smov 66  }
 0x211   : > { %v2851_v41 = vpop.permute.xlu1 %2850  ;;  %v2847_v20 = vpop.permute.xlu0 %2846  ;;  %v2277_v26 = vcombine.low %v2212_v40, %v2228_v0  ;;  %v2278_v47 = vcombine.high %v2212_v40, %v2228_v0 }
 0x212   : > { %v3350_v2 = vsel %vm3349_vm0, %v5559_v15, %v2847_v20  ;;  %v2164_v20 = vcombine.high %v2124_v19, %v2156_v56  ;;  %v2245_v28 = vcombine.low %v2180_v39, %v2196_v23  ;;  %v2244_v15 = vrot.slane %v2230_v58, %v4340_v3 }
 0x213   : > { %3166 = vrot.lane.b32.xlu0 %v2159_v13, %s5560_s26  ;;  %v3352_v30 = vsel %vm3351_vm1, %v3350_v2, %v2851_v41  ;;  %v5572_v2 = vld [vmem:[#allocation36_spill] sm:$0xff]  ;;  %v2285_v43 = vrot.slane %v2277_v26, %v4340_v3  ;;  %v2292_v32 = vrot.slane %v2278_v47, %v4340_v3  ;;  %s5589_s26 = smov 70  }
 0x214   : > { %3170 = vrot.lane.b32.xlu1 %v2160_v42, %s5561_s27  ;;  %v5573_v42 = vld [vmem:[#allocation16_spill] sm:$0xff]  ;;  %v2295_v1 = vcombine.low %v2244_v15, %v2276_v10  ;;  %v2296_v60 = vcombine.high %v2244_v15, %v2276_v10  ;;  %v2253_v16 = vrot.slane %v2245_v28, %v4340_v3  ;;  %s5595_s27 = smov 74  }
 0x215   : > { %v2855_v25 = vpop.permute.xlu0 %2854  ;;  %v2859_v27 = vpop.permute.xlu1 %2858 }
 0x216   : > { %v3354_v22 = vsel %vm3353_vm2, %v3352_v30, %v2855_v25  ;;  %v2294_v25 = vcombine.high %v2237_v33, %v2269_v38  ;;  %v2246_v30 = vcombine.high %v2180_v39, %v2196_v23  ;;  %v2298_v40 = vcombine.high %v2253_v16, %v2285_v43 }
 0x217   : > { %3174 = vrot.lane.b32.xlu0 %v2161_v12, %s5562_s28  ;;  %v3356_v52 = vsel %vm3355_vm3, %v3354_v22, %v2859_v27  ;;  %v2301_v27 = vcombine.low %v5573_v42, %v5572_v2  ;;  %v2325_v22 = vrot.slane %v2317_v35, %v4208_v5  ;;  %v2302_v23 = vcombine.high %v5573_v42, %v5572_v2  ;;  %v5581_v2 = vld [vmem:[#allocation47_spill] sm:$0xff]  ;;  %v5582_v42 = vld [vmem:[#allocation25_spill] sm:$0xff]  ;;  %s5600_s28 = smov 76  }
 0x218   : > { %3178 = vrot.lane.b32.xlu1 %v2162_v63, %s5563_s29  ;;  %v2341_v63 = vrot.slane %v2333_v53, %v4208_v5  ;;  %s5601_s29 = smov 78  }
 0x219   : > { %v2863_v9 = vpop.permute.xlu0 %2862  ;;  %v2867_v62 = vpop.permute.xlu1 %2866  ;;  %v2309_v21 = vrot.slane %v2301_v27, %v4208_v5  ;;  %v2453_v27 = vcombine.low %v5582_v42, %v5581_v2 }
 0x21a   : > { %v3358_v41 = vsel %vm3357_vm4, %v3356_v52, %v2863_v9  ;;  %v2350_v9 = vcombine.high %v5566_v48, %v4692_v29  ;;  %v2397_v19 = vcombine.low %v2341_v63, %v2357_v51  ;;  %v2318_v52 = vcombine.high %v5568_v31, %v5567_v37 }
 0x21b   : > { %3182 = vrot.lane.b32.xlu0 %v2163_v57, %s5564_s30  ;;  %v3360_v8 = vsel %vm3359_vm5, %v3358_v41, %v2867_v62  ;;  %v2297_v62 = vcombine.low %v2253_v16, %v2285_v43  ;;  %v2365_v41 = vcombine.low %v2309_v21, %v2325_v22  ;;  %v2334_v29 = vcombine.high %v5570_v17, %v5569_v49  ;;  %v5584_v43 = vld [vmem:[#allocation57_spill] sm:$0xff]  ;;  %s3931_s30 = smov 88  }
 0x21c   : > { %3186 = vrot.lane.b32.xlu1 %v2164_v20, %s5565_s2  ;;  %v2260_v20 = vrot.slane %v2246_v30, %v4340_v3  ;;  %v2364_v58 = vrot.slane %v2350_v9, %v4208_v5  ;;  %v2405_v48 = vrot.slane %v2397_v19, %v4340_v3  ;;  %v2332_v50 = vrot.slane %v2318_v52, %v4208_v5  ;;  %s3932_s2 = smov 90  }
 0x21d   : > { %v2871_v55 = vpop.permute.xlu0 %2870  ;;  %v2366_v37 = vcombine.high %v2309_v21, %v2325_v22  ;;  %v2348_v31 = vrot.slane %v2334_v29, %v4208_v5  ;;  %v2373_v35 = vrot.slane %v2365_v41, %v4340_v3 }
 0x21e   : > { %v2875_v18 = vpop.permute.xlu1 %2874  ;;  %v3362_v13 = vsel %vm3361_vm6, %v3360_v8, %v2871_v55  ;;  %v2398_v55 = vcombine.high %v2341_v63, %v2357_v51  ;;  %v2299_v26 = vcombine.low %v2260_v20, %v2292_v32  ;;  %v2300_v10 = vcombine.high %v2260_v20, %v2292_v32 }
 0x21f   : > { %3190 = vrot.lane.b32.xlu0 %v2293_v36, %s5571_s3  ;;  %v3364_v4 = vsel %vm3363_vm7, %v3362_v13, %v2875_v18  ;;  %v2316_v18 = vrot.slane %v2302_v23, %v4208_v5  ;;  %v5580_v13 = vld [vmem:[#allocation67_spill] sm:$0xff]  ;;  %v2413_v28 = vcombine.low %v2348_v31, %v2364_v58  ;;  %v2429_v53 = vcombine.low %v2373_v35, %v2405_v48  ;;  %s3933_s3 = smov 92  }
 0x220   : > { %3194 = vrot.lane.b32.xlu1 %v2294_v25, %s5574_s4  ;;  %v2485_v25 = vcombine.low %v5580_v13, %v4690_v24  ;;  %v2412_v15 = vrot.slane %v2398_v55, %v4340_v3  ;;  %v2414_v16 = vcombine.high %v2348_v31, %v2364_v58  ;;  %v5594_v31 = vld [vmem:[#allocation61_spill] sm:$0xff]  ;;  %s3934_s4 = smov 94  }
 0x221   : > { %v2879_v14 = vpop.permute.xlu0 %2878 }
 0x222   : > { %v2883_v12 = vpop.permute.xlu1 %2882  ;;  %v3366_v56 = vsel %vm3365_vm8, %v3364_v4, %v2879_v14  ;;  %v2430_v4 = vcombine.high %v2373_v35, %v2405_v48  ;;  %v2381_v14 = vcombine.low %v2316_v18, %v2332_v50  ;;  %v4831_v63 = vrot.slane %v2485_v25, %v4208_v5 }
 0x223   : > { %3198 = vrot.lane.b32.xlu0 %v2295_v1, %s5575_s5  ;;  %v3368_v44 = vsel %vm3367_vm9, %v3366_v56, %v2883_v12  ;;  %v5583_v1 = vld [vmem:[#allocation77_spill] sm:$0xff]  ;;  %v2380_v12 = vrot.slane %v2366_v37, %v4340_v3  ;;  %v5586_v56 = vld [vmem:[#allocation35_spill] sm:$0xff]  ;;  %v2428_v55 = vrot.slane %v2414_v16, %v4340_v3  ;;  %s3935_s5 = smov 96  }
 0x224   : > { %3202 = vrot.lane.b32.xlu1 %v2296_v60, %s5576_s11  ;;  %v2469_v30 = vcombine.low %v5584_v43, %v5583_v1  ;;  %v5587_v60 = vld [vmem:[#allocation15_spill] sm:$0xff]  ;;  %s3936_s11 = smov 98  }
 0x225   : > { %v2887_v0 = vpop.permute.xlu0 %2886  ;;  %v2437_v22 = vcombine.low %v5587_v60, %v5586_v56  ;;  %v2431_v19 = vcombine.low %v2380_v12, %v2412_v15  ;;  %v2432_v52 = vcombine.high %v2380_v12, %v2412_v15  ;;  %v5593_v37 = vld [vmem:[#allocation83_spill] sm:$0xff] }
 0x226   : > { %v2891_v57 = vpop.permute.xlu1 %2890  ;;  %v3370_v38 = vsel %vm3369_vm10, %v3368_v44, %v2887_v0  ;;  %v2421_v44 = vrot.slane %v2413_v28, %v4340_v3  ;;  %v4837_v0 = vrot.slane %v2453_v27, %v4208_v5  ;;  %v1398_v35 = vcombine.high %v5594_v31, %v5593_v37  ;;  %v5599_v12 = vld [vmem:[#allocation51_spill] sm:$0xff] }
 0x227   : > { %3206 = vrot.lane.b32.xlu0 %v2297_v62, %s5577_s13  ;;  %v3372_v33 = vsel %vm3371_vm11, %v3370_v38, %v2891_v57  ;;  %v2382_v57 = vcombine.high %v2316_v18, %v2332_v50  ;;  %v2477_v38 = vrot.slane %v2469_v30, %v4208_v5  ;;  %v2445_v41 = vrot.slane %v2437_v22, %v4208_v5  ;;  %v5598_v30 = vld [vmem:[#allocation71_spill] sm:$0xff]  ;;  %s3937_s13 = smov 100  }
 0x228   : > { %3210 = vrot.lane.b32.xlu1 %v2298_v40, %s5578_s14  ;;  %v2389_v40 = vrot.slane %v2381_v14, %v4340_v3  ;;  %v2486_v18 = vcombine.high %v5580_v13, %v4690_v24  ;;  %v1382_v22 = vcombine.high %v5599_v12, %v5598_v30  ;;  %v2438_v13 = vcombine.high %v5587_v60, %v5586_v56  ;;  %s3938_s14 = smov 102  }
 0x229   : > { %v2895_v39 = vpop.permute.xlu0 %2894  ;;  %v2533_v29 = vcombine.low %v2477_v38, %v4831_v63  ;;  %v2501_v48 = vcombine.low %v2445_v41, %v4837_v0  ;;  %v2396_v50 = vrot.slane %v2382_v57, %v4340_v3  ;;  %v2502_v16 = vcombine.high %v2445_v41, %v4837_v0 }
 0x22a   : > { %v2899_v8 = vpop.permute.xlu1 %2898  ;;  %v3374_v36 = vsel %vm5420_vm12, %v3372_v33, %v2895_v39  ;;  %vm5423_vm12 = vcmask 277504   ;;  %v2433_v58 = vcombine.low %v2389_v40, %v2421_v44 }
 0x22b   : > { %3214 = vrot.lane.b32.xlu0 %v2299_v26, %s5579_s16  ;;  %v3376_v49 = vsel %vm5422_vm13, %v3374_v36, %v2899_v8  ;;  %vm5425_vm13 = vcmask 310272   ;;  %v2434_v26 = vcombine.high %v2389_v40, %v2421_v44  ;;  %v5591_v8 = vld [vmem:[#allocation29_spill] sm:$0xff]  ;;  %v5592_v36 = vld [vmem:[#allocation8_spill] sm:$0xff]  ;;  %v2509_v24 = vrot.slane %v2501_v48, %v4340_v3  ;;  %s3939_s16 = smov 104  }
 0x22c   : > { %3218 = vrot.lane.b32.xlu1 %v2300_v10, %s3918_s22  ;;  %s5585_s22 = smov 64   ;;  %v1350_v10 = vcombine.high %v5592_v36, %v5591_v8  ;;  %v2516_v57 = vrot.slane %v2502_v16, %v4340_v3  ;;  %v4905_v40 = vrot.slane %v2438_v13, %v4208_v5  ;;  %v5610_v16 = vld [vmem:[#allocation21_spill] sm:$0xff] }
 0x22d   : > { %v2903_v17 = vpop.permute.xlu0 %2902 }
 0x22e   : > { %v2907_v47 = vpop.permute.xlu1 %2906  ;;  %v3378_v51 = vsel %vm5421_vm14, %v3376_v49, %v2903_v17  ;;  %vm5428_vm14 = vcmask 293888   ;;  %v2435_v49 = vcombine.low %v2396_v50, %v2428_v55  ;;  %v2541_v17 = vrot.slane %v2533_v29, %v4340_v3 }
 0x22f   : > { %3222 = vrot.lane.b32.xlu0 %v2429_v53, %s5585_s22  ;;  %v3380_v21 = vsel %vm5424_vm15, %v3378_v51, %v2907_v47  ;;  %vm5427_vm15 = vcmask 343040   ;;  %v2534_v53 = vcombine.high %v2477_v38, %v4831_v63  ;;  %v2436_v47 = vcombine.high %v2396_v50, %v2428_v55  ;;  %v5596_v51 = vld [vmem:[#allocation39_spill] sm:$0xff] }
 0x230   : > { %3226 = vrot.lane.b32.xlu1 %v2430_v4, %s5588_s25  ;;  %v5597_v4 = vld [vmem:[#allocation19_spill] sm:$0xff]  ;;  %v2454_v63 = vcombine.high %v5582_v42, %v5581_v2  ;;  %v2565_v56 = vcombine.low %v2509_v24, %v2541_v17  ;;  %v2566_v42 = vcombine.high %v2509_v24, %v2541_v17  ;;  %v4902_v38 = vrot.slane %v1350_v10, %v4208_v5  ;;  %s3940_s25 = smov 106  }
 0x231   : > { %v2911_v9 = vpop.permute.xlu0 %2910  ;;  %v1366_v14 = vcombine.high %v5597_v4, %v5596_v51  ;;  %v2548_v0 = vrot.slane %v2534_v53, %v4340_v3  ;;  %v5606_v53 = vld [vmem:[#allocation84_spill] sm:$0xff] }
 0x232   : > { %v2915_v62 = vpop.permute.xlu1 %2914  ;;  %v3382_v32 = vsel %vm5423_vm12, %v3380_v21, %v2911_v9  ;;  %vm5426_vm12 = vcmask 326656   ;;  %v2470_v21 = vcombine.high %v5584_v43, %v5583_v1  ;;  %v4878_v9 = vrot.slane %v1398_v35, %v4208_v5  ;;  %v5602_v35 = vld [vmem:[#allocation31_spill] sm:$0xff] }
 0x233   : > { %3230 = vrot.lane.b32.xlu0 %v2431_v19, %s3921_s20  ;;  %v3384_v20 = vsel %vm5428_vm14, %v3382_v32, %v2915_v62  ;;  %s5590_s20 = smov 72   ;;  %v4881_v19 = vrot.slane %v2486_v18, %v4208_v5  ;;  %v4887_v1 = vrot.slane %v1366_v14, %v4208_v5  ;;  %v4890_v43 = vrot.slane %v1382_v22, %v4208_v5  ;;  %v5603_v18 = vld [vmem:[#allocation10_spill] sm:$0xff] }
 0x234   : > { %3234 = vrot.lane.b32.xlu1 %v2432_v52, %s5589_s26  ;;  %vm5431_vm14 = vcmask 408576   ;;  %v4894_v32 = vrot.slane %v2454_v63, %v4208_v5  ;;  %v4897_v52 = vrot.slane %v2470_v21, %v4208_v5  ;;  %v2568_v37 = vcombine.high %v2516_v57, %v2548_v0  ;;  %v5609_v63 = vld [vmem:[#allocation41_spill] sm:$0xff]  ;;  %s3941_s26 = smov 108  }
 0x235   : > { %v2919_v23 = vpop.permute.xlu0 %2918  ;;  %v1461_v41 = vcombine.low %v4890_v43, %v4878_v9  ;;  %v1462_v51 = vcombine.high %v4890_v43, %v4878_v9  ;;  %v1430_v13 = vcombine.high %v4902_v38, %v4887_v1  ;;  %v1501_v21 = vcombine.low %v5610_v16, %v5609_v63  ;;  %v5611_v9 = vld [vmem:[#allocation73_spill] sm:$0xff] }
 0x236   : > { %v2923_v33 = vpop.permute.xlu1 %2922  ;;  %v3386_v39 = vsel %vm5425_vm13, %v3384_v20, %v2919_v23  ;;  %vm5430_vm13 = vcmask 359424   ;;  %v2549_v23 = vcombine.low %v4897_v52, %v4881_v19  ;;  %v2550_v30 = vcombine.high %v4897_v52, %v4881_v19 }
 0x237   : > { %3238 = vrot.lane.b32.xlu0 %v2433_v58, %s5590_s20  ;;  %v3388_v25 = vsel %vm5426_vm12, %v3386_v39, %v2923_v33  ;;  %vm5429_vm12 = vcmask 375808   ;;  %v2567_v33 = vcombine.low %v2516_v57, %v2548_v0  ;;  %v1429_v39 = vcombine.low %v4902_v38, %v4887_v1  ;;  %v5616_v0 = vld [vmem:[#allocation60_spill] sm:$0xff]  ;;  %s3942_s20 = smov 110  }
 0x238   : > { %3242 = vrot.lane.b32.xlu1 %v2434_v26, %s5595_s27  ;;  %v2517_v26 = vcombine.low %v4905_v40, %v4894_v32  ;;  %v1469_v8 = vrot.slane %v1461_v41, %v4340_v3  ;;  %v2557_v31 = vrot.slane %v2549_v23, %v4340_v3  ;;  %v2518_v19 = vcombine.high %v4905_v40, %v4894_v32  ;;  %s3943_s27 = smov 112  }
 0x239   : > { %v2927_v28 = vpop.permute.xlu0 %2926  ;;  %v4959_v52 = vrot.slane %v2621_v11, %v4208_v5  ;;  %v2564_v23 = vrot.slane %v2550_v30, %v4340_v3 }
 0x23a   : > { %v2931_v15 = vpop.permute.xlu1 %2930  ;;  %v3390_v27 = vsel %vm5427_vm15, %v3388_v25, %v2927_v28  ;;  %vm5432_vm15 = vcmask 392192   ;;  %v1485_v25 = vcombine.low %v5603_v18, %v5602_v35  ;;  %v5604_v28 = vld [vmem:[#allocation38_spill] sm:$0xff] }
 0x23b   : > { %3246 = vrot.lane.b32.xlu0 %v2435_v49, %s5600_s28  ;;  %v3392_v44 = vsel %vm5430_vm13, %v3390_v27, %v2931_v15  ;;  %vm5433_vm13 = vcmask 441344   ;;  %v5605_v49 = vld [vmem:[#allocation18_spill] sm:$0xff]  ;;  %v5607_v15 = vld [vmem:[#allocation63_spill] sm:$0xff]  ;;  %s3944_s28 = smov 114  }
 0x23c   : > { %3250 = vrot.lane.b32.xlu1 %v2436_v47, %s5601_s29  ;;  %v2573_v17 = vcombine.low %v5605_v49, %v5604_v28  ;;  %v1533_v27 = vcombine.low %v5607_v15, %v5606_v53  ;;  %v2525_v47 = vrot.slane %v2517_v26, %v4340_v3  ;;  %s3945_s29 = smov 116  }
 0x23d   : > { %v2935_v62 = vpop.permute.xlu0 %2934 }
 0x23e   : > { %v2939_v60 = vpop.permute.xlu1 %2938  ;;  %v3394_v2 = vsel %vm5429_vm12, %v3392_v44, %v2935_v62  ;;  %vm5438_vm12 = vcmask 424960   ;;  %v2569_v24 = vcombine.low %v2525_v47, %v2557_v31  ;;  %v5612_v44 = vld [vmem:[#allocation53_spill] sm:$0xff]  ;;  %v4956_v1 = vrot.slane %v1533_v27, %v4208_v5 }
 0x23f   : > { %3254 = vrot.lane.b32.xlu0 %v2565_v56, %s3927_s24  ;;  %v3396_v29 = vsel %vm5432_vm15, %v3394_v2, %v2939_v60  ;;  %s3930_s24 = smov 86   ;;  %vm5435_vm15 = vcmask 474112   ;;  %v1517_v62 = vcombine.low %v5612_v44, %v5611_v9  ;;  %v5613_v56 = vld [vmem:[#allocation50_spill] sm:$0xff]  ;;  %v5614_v60 = vld [vmem:[#allocation28_spill] sm:$0xff] }
 0x240   : > { %3258 = vrot.lane.b32.xlu1 %v2566_v42, %s3928_s23  ;;  %s3929_s23 = smov 84   ;;  %v2589_v2 = vcombine.low %v5614_v60, %v5613_v56  ;;  %v5615_v42 = vld [vmem:[#allocation80_spill] sm:$0xff] }
 0x241   : > { %v2943_v20 = vpop.permute.xlu0 %2942  ;;  %v2605_v43 = vcombine.low %v5616_v0, %v5615_v42 }
 0x242   : > { %v2947_v58 = vpop.permute.xlu1 %2946  ;;  %v3398_v55 = vsel %vm5431_vm14, %v3396_v29, %v2943_v20  ;;  %vm5434_vm14 = vcmask 457728   ;;  %v1476_v29 = vrot.slane %v1462_v51, %v4340_v3  ;;  %v2570_v20 = vcombine.high %v2525_v47, %v2557_v31 }
 0x243   : > { %3010 = vrot.lane.b32.xlu0 %v1479_v46, %s3929_s23  ;;  %v3400_v48 = vsel %vm5438_vm12, %v3398_v55, %v2947_v58  ;;  %v1437_v46 = vrot.slane %v1429_v39, %v4340_v3  ;;  %v4966_v58 = vrot.slane %v1501_v21, %v4208_v5  ;;  %v4969_v55 = vrot.slane %v1517_v62, %v4208_v5 }
 0x244   : > { %3262 = vrot.lane.b32.xlu1 %v2567_v33, %s3929_s23  ;;  %v1444_v33 = vrot.slane %v1430_v13, %v4340_v3  ;;  %v4973_v39 = vrot.slane %v1485_v25, %v4208_v5  ;;  %v4976_v26 = vrot.slane %v2589_v2, %v4208_v5  ;;  %vm5441_vm12 = vcmask 572416   ;;  %s3946_s23 = smov 118  }
 0x245   : > { %v2951_v50 = vpop.permute.xlu0 %2950  ;;  %v1481_v14 = vcombine.low %v1437_v46, %v1469_v8  ;;  %v1482_v41 = vcombine.high %v1437_v46, %v1469_v8  ;;  %v4983_v8 = vrot.slane %v2573_v17, %v4208_v5  ;;  %v1486_v62 = vcombine.high %v5603_v18, %v5602_v35 }
 0x246   : > { %v2955_v36 = vpop.permute.xlu1 %2954  ;;  %v3402_v10 = vsel %vm5433_vm13, %v3400_v48, %v2951_v50  ;;  %vm5436_vm13 = vcmask 490496   ;;  %v4979_v48 = vrot.slane %v2605_v43, %v4208_v5  ;;  %v2532_v50 = vrot.slane %v2518_v19, %v4340_v3 }
 0x247   : > { %3014 = vrot.lane.b32.xlu0 %v1480_v7, %s3930_s24  ;;  %v3404_v7 = vsel %vm5434_vm14, %v3402_v10, %v2955_v36  ;;  %vm5437_vm14 = vcmask 506880   ;;  %v1581_v36 = vcombine.low %v4969_v55, %v4956_v1  ;;  %v1483_v31 = vcombine.low %v1444_v33, %v1476_v29 }
 0x248   : > { %3266 = vrot.lane.b32.xlu1 %v2568_v37, %s3930_s24  ;;  %v2669_v46 = vcombine.low %v4979_v48, %v4959_v52  ;;  %v2571_v47 = vcombine.low %v2532_v50, %v2564_v23  ;;  %v1549_v51 = vcombine.low %v4973_v39, %v4966_v58  ;;  %v2637_v17 = vcombine.low %v4983_v8, %v4976_v26  ;;  %s3947_s24 = smov 120  }
 0x249   : > { %v2959_v4 = vpop.permute.xlu0 %2958  ;;  %v2574_v19 = vcombine.high %v5605_v49, %v5604_v28  ;;  %v1502_v43 = vcombine.high %v5610_v16, %v5609_v63  ;;  %v2622_v35 = vcombine.high %v5608_v45, %v4712_v61  ;;  %v2670_v18 = vcombine.high %v4979_v48, %v4959_v52 }
 0x24a   : > { %v2963_v12 = vpop.permute.xlu1 %2962  ;;  %v3406_v22 = vsel %vm5435_vm15, %v3404_v7, %v2959_v4  ;;  %vm5439_vm15 = vcmask 523264   ;;  %v1484_v4 = vcombine.high %v1444_v33, %v1476_v29  ;;  %v1557_v21 = vrot.slane %v1549_v51, %v4340_v3 }
 0x24b   : > { %3018 = vrot.lane.b32.xlu0 %v1481_v14, %s3931_s30  ;;  %v3408_v57 = vsel %vm5436_vm13, %v3406_v22, %v2963_v12  ;;  %vm5440_vm13 = vcmask 539648   ;;  %v1589_v14 = vrot.slane %v1581_v36, %v4340_v3  ;;  %v2572_v22 = vcombine.high %v2532_v50, %v2564_v23 }
 0x24c   : > { %3270 = vrot.lane.b32.xlu1 %v2569_v24, %s3931_s30  ;;  %v2677_v24 = vrot.slane %v2669_v46, %v4340_v3  ;;  %v2645_v2 = vrot.slane %v2637_v17, %v4340_v3  ;;  %v1550_v63 = vcombine.high %v4973_v39, %v4966_v58  ;;  %v2590_v61 = vcombine.high %v5614_v60, %v5613_v56  ;;  %s3948_s30 = smov 122  }
 0x24d   : > { %v2967_v38 = vpop.permute.xlu0 %2966  ;;  %v1613_v29 = vcombine.low %v1557_v21, %v1589_v14  ;;  %v2638_v45 = vcombine.high %v4983_v8, %v4976_v26  ;;  %v2606_v16 = vcombine.high %v5616_v0, %v5615_v42  ;;  %v1614_v52 = vcombine.high %v1557_v21, %v1589_v14 }
 0x24e   : > { %v2971_v32 = vpop.permute.xlu1 %2970  ;;  %v3410_v40 = vsel %vm5437_vm14, %v3408_v57, %v2967_v38  ;;  %vm3415_vm14 = vcmask 556032   ;;  %v1534_v57 = vcombine.high %v5607_v15, %v5606_v53  ;;  %v1582_v38 = vcombine.high %v4969_v55, %v4956_v1 }
 0x24f   : > { %3022 = vrot.lane.b32.xlu0 %v1482_v41, %s3932_s2  ;;  %v3412_v10 = vsel %vm5439_vm15, %v3410_v40, %v2971_v32  ;;  %vm5442_vm15 = vcmask 588800   ;;  %v2701_v32 = vcombine.low %v2645_v2, %v2677_v24  ;;  %v1518_v53 = vcombine.high %v5612_v44, %v5611_v9 }
 0x250   : > { %3274 = vrot.lane.b32.xlu1 %v2570_v20, %s3932_s2  ;;  %v5031_v9 = vrot.slane %v1502_v43, %v4208_v5  ;;  %v5034_v44 = vrot.slane %v1534_v57, %v4208_v5  ;;  %v1596_v40 = vrot.slane %v1582_v38, %v4340_v3  ;;  %v5038_v56 = vrot.slane %v2622_v35, %v4208_v5  ;;  %v5619_v43 = vld [vmem:[#allocation69_spill] sm:$0xff]  ;;  %s3949_s2 = smov 124  }
 0x251   : > { %v2975_v37 = vpop.permute.xlu0 %2974  ;;  %v2702_v42 = vcombine.high %v2645_v2, %v2677_v24  ;;  %v2684_v0 = vrot.slane %v2670_v18, %v4340_v3  ;;  %v5043_v23 = vrot.slane %v1518_v53, %v4208_v5  ;;  %v1564_v55 = vrot.slane %v1550_v63, %v4340_v3  ;;  %v5620_v18 = vld [vmem:[#allocation40_spill] sm:$0xff] }
 0x252   : > { %v2979_v25 = vpop.permute.xlu1 %2978  ;;  %v3414_v27 = vsel %vm5440_vm13, %v3412_v10, %v2975_v37  ;;  %vm5443_vm13 = vcmask 605184   ;;  %v5048_v33 = vrot.slane %v2590_v61, %v4208_v5  ;;  %v2620_v39 = vrot.slane %v2606_v16, %v4208_v5  ;;  %v5622_v63 = vld [vmem:[#allocation72_spill] sm:$0xff]  ;;  %v5625_v16 = vld [vmem:[#allocation9_spill] sm:$0xff] }
 0x253   : > { %3026 = vrot.lane.b32.xlu0 %v1483_v31, %s3933_s3  ;;  %v3416_v11 = vsel %vm3415_vm14, %v3414_v27, %v2979_v25  ;;  %v2652_v26 = vrot.slane %v2638_v45, %v4340_v3  ;;  %v5053_v48 = vrot.slane %v1486_v62, %v4208_v5  ;;  %v1597_v50 = vcombine.low %v5043_v23, %v5034_v44  ;;  %v5623_v53 = vld [vmem:[#allocation52_spill] sm:$0xff]  ;;  %v5624_v45 = vld [vmem:[#allocation30_spill] sm:$0xff] }
 0x254   : > { %3278 = vrot.lane.b32.xlu1 %v2571_v47, %s3933_s3  ;;  %v1615_v36 = vcombine.low %v1564_v55, %v1596_v40  ;;  %v5058_v10 = vrot.slane %v2574_v19, %v4208_v5  ;;  %v2685_v37 = vcombine.low %v2620_v39, %v5038_v56  ;;  %v5617_v47 = vcombine.low %v4445_v54, %v4448_v34  ;;  %s3950_s3 = smov 126  }
 0x255   : > { %v2983_v7 = vpop.permute.xlu0 %2982  ;;  %v2703_v25 = vcombine.low %v2652_v26, %v2684_v0  ;;  %v1565_v27 = vcombine.low %v5053_v48, %v5031_v9  ;;  %v1598_v62 = vcombine.high %v5043_v23, %v5034_v44  ;;  %v2757_v57 = vcombine.low %v5619_v43, %v4710_v6 }
 0x256   : > { %v2987_v30 = vpop.permute.xlu1 %2986  ;;  %v3418_v12 = vsel %vm5441_vm12, %v3416_v11, %v2983_v7  ;;  %vm5444_vm12 = vcmask 621568   ;;  %v2653_v17 = vcombine.low %v5058_v10, %v5048_v33  ;;  %v1616_v7 = vcombine.high %v1564_v55, %v1596_v40 }
 0x257   : > { %3030 = vrot.lane.b32.xlu0 %v1484_v4, %s3934_s4  ;;  %v3420_v13 = vsel %vm5442_vm15, %v3418_v12, %v2987_v30  ;;  %vm3425_vm15 = vcmask 637952   ;;  %v1605_v4 = vrot.slane %v1597_v50, %v4340_v3  ;;  %v2704_v12 = vcombine.high %v2652_v26, %v2684_v0  ;;  %v5631_v0 = vld [vmem:[#allocation17_spill] sm:$0xff] }
 0x258   : > { %3282 = vrot.lane.b32.xlu1 %v2572_v22, %s3934_s4  ;;  %v2693_v22 = vrot.slane %v2685_v37, %v4340_v3  ;;  %v1573_v34 = vrot.slane %v1565_v27, %v4340_v3  ;;  %v2661_v24 = vrot.slane %v2653_v17, %v4340_v3  ;;  %v2686_v38 = vcombine.high %v2620_v39, %v5038_v56  ;;  %s3669_s4 = sshll.u32 %s4067_s21, 5 }
 0x259   : > { %v2991_v41 = vpop.permute.xlu0 %2990  ;;  %v1621_v44 = vcombine.low %v5625_v16, %v5624_v45  ;;  %v2654_v56 = vcombine.high %v5058_v10, %v5048_v33  ;;  %v1612_v26 = vrot.slane %v1598_v62, %v4340_v3 }
 0x25a   : > { %v2995_v28 = vpop.permute.xlu1 %2994  ;;  %v3422_v49 = vsel %vm5443_vm13, %v3420_v13, %v2991_v41  ;;  %vm3427_vm13 = vcmask 654336   ;;  %v5618_v13 = vld [vmem:[#allocation62_spill] sm:$0xff]  ;;  %v1617_v2 = vcombine.low %v1573_v34, %v1605_v4  ;;  %v2705_v35 = vcombine.low %v2661_v24, %v2693_v22 }
 0x25b   : > { %3034 = vrot.lane.b32.xlu0 %v1613_v29, %s3935_s5  ;;  %v3424_v15 = vsel %vm5444_vm12, %v3422_v49, %v2995_v28  ;;  %vm3429_vm12 = vcmask 670720   ;;  %v1669_v21 = vcombine.low %v5618_v13, %v4607_v59  ;;  %v5621_v28 = vld [vmem:[#allocation20_spill] sm:$0xff]  ;;  %v1618_v39 = vcombine.high %v1573_v34, %v1605_v4 }
 0x25c   : > { %3286 = vrot.lane.b32.xlu1 %v2701_v32, %s3935_s5  ;;  %v1637_v49 = vcombine.low %v5621_v28, %v5620_v18  ;;  %v1566_v32 = vcombine.high %v5053_v48, %v5031_v9  ;;  %v5630_v9 = vld [vmem:[#allocation37_spill] sm:$0xff]  ;;  %v5108_v48 = vrot.slane %v2757_v57, %v4208_v5  ;;  %v5124_v17 = vrot.slane %v1621_v44, %v4208_v5 }
 0x25d   : > { %v2999_v1 = vpop.permute.xlu0 %2998  ;;  %v2709_v23 = vcombine.low %v5631_v0, %v5630_v9 }
 0x25e   : > { %v3003_v60 = vpop.permute.xlu1 %3002  ;;  %v3426_v20 = vsel %vm3425_vm15, %v3424_v15, %v2999_v1  ;;  %v1653_v15 = vcombine.low %v5623_v53, %v5622_v63  ;;  %v5626_v1 = vld [vmem:[#allocation49_spill] sm:$0xff]  ;;  %v5113_v10 = vrot.slane %v1637_v49, %v4208_v5 }
 0x25f   : > { %3038 = vrot.lane.b32.xlu0 %v1614_v52, %s3936_s11  ;;  %v3428_v58 = vsel %vm3427_vm13, %v3426_v20, %v3003_v60  ;;  %v5627_v52 = vld [vmem:[#allocation27_spill] sm:$0xff] }
 0x260   : > { %3290 = vrot.lane.b32.xlu1 %v2702_v42, %s3936_s11  ;;  %v2725_v40 = vcombine.low %v5627_v52, %v5626_v1  ;;  %v5628_v60 = vld [vmem:[#allocation79_spill] sm:$0xff]  ;;  %v1661_v37 = vrot.slane %v1653_v15, %v4208_v5  ;;  %v1685_v34 = vcombine.low %v5124_v17, %v5113_v10  ;;  %v1670_v15 = vcombine.high %v5618_v13, %v4607_v59  ;;  %s5225_s11 = scalar_lea.vmem [#allocation5], %s3669_s4 }
 0x261   : > { %v3007_v8 = vpop.permute.xlu0 %3006  ;;  %v5629_v20 = vld [vmem:[#allocation59_spill] sm:$0xff]  ;;  %v1654_v59 = vcombine.high %v5623_v53, %v5622_v63 }
 0x262   : > { %v3099_v31 = vpop.permute.xlu1 %3098  ;;  %v5062_v46 = vsel %vm3429_vm12, %v3428_v58, %v3007_v8  ;;  %v2741_v42 = vcombine.low %v5629_v20, %v5628_v60  ;;  %v5104_v58 = vrot.slane %v1669_v21, %v4208_v5  ;;  %v2706_v8 = vcombine.high %v2661_v24, %v2693_v22 }
 0x263   : > { %v3475_v51 = vsel %vm3349_vm0, %v5617_v47, %v3099_v31  ;;  %3042 = vrot.lane.b32.xlu0 %v1615_v36, %s3937_s13  ;;  %v2700_v36 = vrot.slane %v2686_v38, %v4340_v3  ;;  %v5119_v27 = vrot.slane %v2725_v40, %v4208_v5  ;;  %v1693_v49 = vrot.slane %v1685_v34, %v4340_v3 }
 0x264   : > { %3294 = vrot.lane.b32.xlu1 %v2703_v25, %s3937_s13  ;;  %v1580_v25 = vrot.slane %v1566_v32, %v4340_v3  ;;  %v2749_v47 = vrot.slane %v2741_v42, %v4208_v5  ;;  %vm5632_vm0 = vcmask 211968   ;;  %v5168_v63 = vrot.slane %v1670_v15, %v4208_v5 }
 0x265   : > { %v3103_v11 = vpop.permute.xlu0 %3102 }
 0x266   : > { %v3107_v14 = vpop.permute.xlu1 %3106  ;;  %v3476_v30 = vsel %vm3351_vm1, %v3475_v51, %v3103_v11  ;;  %v2668_v51 = vrot.slane %v2654_v56, %v4340_v3  ;;  %v1717_v11 = vcombine.low %v1661_v37, %v5104_v58  ;;  %v1619_v4 = vcombine.low %v1580_v25, %v1612_v26 }
 0x267   : > { %v3477_v54 = vsel %vm3353_vm2, %v3476_v30, %v3107_v14  ;;  %3046 = vrot.lane.b32.xlu0 %v1616_v7, %s3938_s14  ;;  %v5128_v14 = vrot.slane %v2709_v23, %v4208_v5  ;;  %v2805_v30 = vcombine.low %v2749_v47, %v5108_v48  ;;  %v2758_v56 = vcombine.high %v5619_v43, %v4710_v6 }
 0x268   : > { %3298 = vrot.lane.b32.xlu1 %v2704_v12, %s3938_s14  ;;  %v2806_v42 = vcombine.high %v2749_v47, %v5108_v48  ;;  %v1622_v6 = vcombine.high %v5625_v16, %v5624_v45  ;;  %v2726_v43 = vcombine.high %v5627_v52, %v5626_v1  ;;  %vm5633_vm1 = vcmask 228352  }
 0x269   : > { %v3111_v19 = vpop.permute.xlu0 %3110  ;;  %v2773_v21 = vcombine.low %v5128_v14, %v5119_v27  ;;  %v5172_v16 = vrot.slane %v2758_v56, %v4208_v5  ;;  %vm5634_vm2 = vcmask 244736  }
 0x26a   : > { %v3115_v41 = vpop.permute.xlu1 %3114  ;;  %v3478_v29 = vsel %vm3355_vm3, %v3477_v54, %v3111_v19  ;;  %v2707_v54 = vcombine.low %v2668_v51, %v2700_v36  ;;  %v1620_v19 = vcombine.high %v1580_v25, %v1612_v26  ;;  %v1638_v26 = vcombine.high %v5621_v28, %v5620_v18 }
 0x26b   : > { %v3479_v61 = vsel %vm3357_vm4, %v3478_v29, %v3115_v41  ;;  %3050 = vrot.lane.b32.xlu0 %v1617_v2, %s3939_s16  ;;  %v1725_v2 = vrot.slane %v1717_v11, %v4340_v3  ;;  %v2708_v41 = vcombine.high %v2668_v51, %v2700_v36  ;;  %v2813_v29 = vrot.slane %v2805_v30, %v4340_v3 }
 0x26c   : > { %3302 = vrot.lane.b32.xlu1 %v2705_v35, %s3939_s16  ;;  %v2781_v32 = vrot.slane %v2773_v21, %v4340_v3  ;;  %v2742_v18 = vcombine.high %v5629_v20, %v5628_v60  ;;  %v2710_v28 = vcombine.high %v5631_v0, %v5630_v9  ;;  %v2820_v60 = vrot.slane %v2806_v42, %v4340_v3 }
 0x26d   : > { %v3119_v55 = vpop.permute.xlu0 %3118  ;;  %v1749_v40 = vcombine.low %v1693_v49, %v1725_v2  ;;  %v1750_v48 = vcombine.high %v1693_v49, %v1725_v2  ;;  %v1652_v20 = vrot.slane %v1638_v26, %v4208_v5  ;;  %v1668_v9 = vrot.slane %v1654_v59, %v4208_v5 }
 0x26e   : > { %v3123_v50 = vpop.permute.xlu1 %3122  ;;  %v3480_v33 = vsel %vm3359_vm5, %v3479_v61, %v3119_v55  ;;  %v1718_v61 = vcombine.high %v1661_v37, %v5104_v58  ;;  %v2774_v58 = vcombine.high %v5128_v14, %v5119_v27  ;;  %v2740_v36 = vrot.slane %v2726_v43, %v4208_v5 }
 0x26f   : > { %v3481_v31 = vsel %vm3361_vm6, %v3480_v33, %v3123_v50  ;;  %3054 = vrot.lane.b32.xlu0 %v1618_v39, %s3940_s25  ;;  %v2837_v39 = vcombine.low %v2781_v32, %v2813_v29  ;;  %v1686_v50 = vcombine.high %v5124_v17, %v5113_v10  ;;  %v2838_v33 = vcombine.high %v2781_v32, %v2813_v29 }
 0x270   : > { %3306 = vrot.lane.b32.xlu1 %v2706_v8, %s3940_s25  ;;  %v1732_v45 = vrot.slane %v1718_v61, %v4340_v3  ;;  %v2756_v10 = vrot.slane %v2742_v18, %v4208_v5  ;;  %v2788_v37 = vrot.slane %v2774_v58, %v4340_v3  ;;  %v1733_v25 = vcombine.low %v1668_v9, %v5168_v63  ;;  %s3951_s25 = smov [#allocation5]  }
 0x271   : > { %v3127_v7 = vpop.permute.xlu0 %3126  ;;  %v1700_v8 = vrot.slane %v1686_v50, %v4340_v3  ;;  %v2724_v51 = vrot.slane %v2710_v28, %v4208_v5  ;;  %vm5635_vm3 = vcmask 261120   ;;  %vm5636_vm4 = vcmask 277504  }
 0x272   : > { %v3131_v12 = vpop.permute.xlu1 %3130  ;;  %v3482_v22 = vsel %vm3363_vm7, %v3481_v31, %v3127_v7  ;;  %v1636_v31 = vrot.slane %v1622_v6, %v4208_v5  ;;  %v2821_v17 = vcombine.low %v2756_v10, %v5172_v16  ;;  %v1741_v34 = vrot.slane %v1733_v25, %v4340_v3 }
 0x273   : > { %v3483_v24 = vsel %vm3365_vm8, %v3482_v22, %v3131_v12  ;;  %3058 = vrot.lane.b32.xlu0 %v1619_v4, %s3941_s26  ;;  %v1751_v47 = vcombine.low %v1700_v8, %v1732_v45  ;;  %v2839_v4 = vcombine.low %v2788_v37, %v2820_v60  ;;  %v2789_v12 = vcombine.low %v2724_v51, %v2740_v36 }
 0x274   : > { %3310 = vrot.lane.b32.xlu1 %v2707_v54, %s3941_s26  ;;  %v1701_v14 = vcombine.low %v1636_v31, %v1652_v20  ;;  %v1752_v54 = vcombine.high %v1700_v8, %v1732_v45  ;;  %vm5637_vm5 = vcmask 293888   ;;  %v2840_v21 = vcombine.high %v2788_v37, %v2820_v60  ;;  %s3821_s26 = sshll.u32 %s3951_s25, 4  ;;  %s3822_s26 = int_to_ptr.vmem [resolvable:$false] %s3821_s26 }
 0x275   : > { %v3135_v62 = vpop.permute.xlu0 %3134  ;;  %vm5638_vm6 = vcmask 310272   ;;  %vm5639_vm7 = vcmask 326656   ;;  %v1702_v61 = vcombine.high %v1636_v31, %v1652_v20  ;;  %vm5640_vm8 = vcmask 343040  }
 0x276   : > { %v3139_v57 = vpop.permute.xlu1 %3138  ;;  %v3484_v38 = vsel %vm3367_vm9, %v3483_v24, %v3135_v62  ;;  %v2829_v62 = vrot.slane %v2821_v17, %v4340_v3  ;;  %v1709_v2 = vrot.slane %v1701_v14, %v4340_v3  ;;  %vm5641_vm9 = vcmask 359424  }
 0x277   : > { %v3485_v35 = vsel %vm3369_vm10, %v3484_v38, %v3139_v57  ;;  %3062 = vrot.lane.b32.xlu0 %v1620_v19, %s3942_s20  ;;  %v2797_v57 = vrot.slane %v2789_v12, %v4340_v3  ;;  %v1734_v38 = vcombine.high %v1668_v9, %v5168_v63  ;;  %vm5642_vm10 = vcmask 375808  }
 0x278   : > { %3314 = vrot.lane.b32.xlu1 %v2708_v41, %s3942_s20  ;;  %v1753_v29 = vcombine.low %v1709_v2, %v1741_v34  ;;  %v1754_v42 = vcombine.high %v1709_v2, %v1741_v34  ;;  %s3823_s20 = scalar_lea.vmem %s3822_s26, 1024 }
 0x279   : > { %v3143_v44 = vpop.permute.xlu0 %3142  ;;  %v2841_v15 = vcombine.low %v2797_v57, %v2829_v62  ;;  %v2842_v26 = vcombine.high %v2797_v57, %v2829_v62 }
 0x27a   : > { %v3147_v23 = vpop.permute.xlu1 %3146  ;;  %v3486_v55 = vsel %vm3371_vm11, %v3485_v35, %v3143_v44  ;;  %v2822_v35 = vcombine.high %v2756_v10, %v5172_v16  ;;  %vm5643_vm11 = vcmask 392192  }
 0x27b   : > { %v3487_v13 = vsel %vm5632_vm0, %v3486_v55, %v3147_v23  ;;  %3066 = vrot.lane.b32.xlu0 %v1749_v40, %s3943_s27  ;;  %v2790_v40 = vcombine.high %v2724_v51, %v2740_v36  ;;  %v1748_v23 = vrot.slane %v1734_v38, %v4340_v3  ;;  %vm5644_vm0 = vcmask 408576  }
 0x27c   : > { %3318 = vrot.lane.b32.xlu1 %v2837_v39, %s3943_s27  ;;  %v2836_v50 = vrot.slane %v2822_v35, %v4340_v3 }
 0x27d   : > { %v3151_v53 = vpop.permute.xlu0 %3150  ;;  %v2804_v6 = vrot.slane %v2790_v40, %v4340_v3 }
 0x27e   : > { %v3155_v1 = vpop.permute.xlu1 %3154  ;;  %v3488_v52 = vsel %vm5633_vm1, %v3487_v13, %v3151_v53  ;;  %v1716_v13 = vrot.slane %v1702_v61, %v4340_v3  ;;  %vm5645_vm1 = vcmask 424960  }
 0x27f   : > { %v3489_v0 = vsel %vm5634_vm2, %v3488_v52, %v3155_v1  ;;  %3070 = vrot.lane.b32.xlu0 %v1750_v48, %s3944_s28  ;;  %v2843_v63 = vcombine.low %v2804_v6, %v2836_v50  ;;  %v2844_v52 = vcombine.high %v2804_v6, %v2836_v50  ;;  %vm5646_vm2 = vcmask 441344  }
 0x280   : > { %3322 = vrot.lane.b32.xlu1 %v2838_v33, %s3944_s28  ;;  %v1755_v58 = vcombine.low %v1716_v13, %v1748_v23  ;;  %v1756_v45 = vcombine.high %v1716_v13, %v1748_v23 }
 0x281   : > { %v3159_v27 = vpop.permute.xlu0 %3158 }
 0x282   : > { %v3163_v11 = vpop.permute.xlu1 %3162  ;;  %v3490_v7 = vsel %vm5635_vm3, %v3489_v0, %v3159_v27  ;;  %vm5647_vm3 = vcmask 457728  }
 0x283   : > { %v3491_v30 = vsel %vm5636_vm4, %v3490_v7, %v3163_v11  ;;  %3074 = vrot.lane.b32.xlu0 %v1751_v47, %s3945_s29  ;;  %vm5648_vm4 = vcmask 474112  }
 0x284   : > { %3326 = vrot.lane.b32.xlu1 %v2839_v4, %s3945_s29 }
 0x285   : > { %v3167_v22 = vpop.permute.xlu0 %3166 }
 0x286   : > { %v3171_v24 = vpop.permute.xlu1 %3170  ;;  %v3492_v5 = vsel %vm5637_vm5, %v3491_v30, %v3167_v22  ;;  %vm5649_vm5 = vcmask 490496  }
 0x287   : > { %v3493_v19 = vsel %vm5638_vm6, %v3492_v5, %v3171_v24  ;;  %3078 = vrot.lane.b32.xlu0 %v1752_v54, %s3946_s23  ;;  %vm5650_vm6 = vcmask 506880  }
 0x288   : > { %3330 = vrot.lane.b32.xlu1 %v2840_v21, %s3946_s23 }
 0x289   : > { %v3175_v41 = vpop.permute.xlu0 %3174 }
 0x28a   : > { %v3179_v49 = vpop.permute.xlu1 %3178  ;;  %v3494_v32 = vsel %vm5639_vm7, %v3493_v19, %v3175_v41  ;;  %vm5651_vm7 = vcmask 523264  }
 0x28b   : > { %v3495_v44 = vsel %vm5640_vm8, %v3494_v32, %v3179_v49  ;;  %3082 = vrot.lane.b32.xlu0 %v1753_v29, %s3947_s24  ;;  %vm5652_vm8 = vcmask 539648  }
 0x28c   : > { %3334 = vrot.lane.b32.xlu1 %v2841_v15, %s3947_s24 }
 0x28d   : > { %v3183_v56 = vpop.permute.xlu0 %3182 }
 0x28e   : > { %v3187_v55 = vpop.permute.xlu1 %3186  ;;  %v3496_v39 = vsel %vm5641_vm9, %v3495_v44, %v3183_v56  ;;  %vm5653_vm9 = vcmask 572416  }
 0x28f   : > { %v3497_v59 = vsel %vm5642_vm10, %v3496_v39, %v3187_v55  ;;  %3086 = vrot.lane.b32.xlu0 %v1754_v42, %s3948_s30  ;;  %vm5654_vm10 = vcmask 588800  }
 0x290   : > { %3338 = vrot.lane.b32.xlu1 %v2842_v26, %s3948_s30 }
 0x291   : > { %v3191_v43 = vpop.permute.xlu0 %3190 }
 0x292   : > { %v3195_v18 = vpop.permute.xlu1 %3194  ;;  %v3498_v28 = vsel %vm5643_vm11, %v3497_v59, %v3191_v43  ;;  %vm5655_vm11 = vcmask 605184  }
 0x293   : > { %v3499_v53 = vsel %vm5644_vm0, %v3498_v28, %v3195_v18  ;;  %3090 = vrot.lane.b32.xlu0 %v1755_v58, %s3949_s2  ;;  %vm5656_vm0 = vcmask 621568  }
 0x294   : > { %3342 = vrot.lane.b32.xlu1 %v2843_v63, %s3949_s2 }
 0x295   : > { %v3199_v48 = vpop.permute.xlu0 %3198 }
 0x296   : > { %v3203_v16 = vpop.permute.xlu1 %3202  ;;  %v3500_v1 = vsel %vm5645_vm1, %v3499_v53, %v3199_v48  ;;  %vm3439_vm1 = vcmask 752640  }
 0x297   : > { %3094 = vrot.lane.b32.xlu0 %v1756_v45, %s3950_s3  ;;  %v3501_v3 = vsel %vm5646_vm2, %v3500_v1, %v3203_v16  ;;  %vm3441_vm2 = vcmask 769024  }
 0x298   : > { %3346 = vrot.lane.b32.xlu1 %v2844_v52, %s3950_s3 }
 0x299   : > { %v3207_v33 = vpop.permute.xlu0 %3206 }
 0x29a   : > { %v3211_v60 = vpop.permute.xlu1 %3210  ;;  %v3502_v20 = vsel %vm5647_vm3, %v3501_v3, %v3207_v33  ;;  %vm3443_vm3 = vcmask 785408  }
 0x29b   : > { %v3503_v9 = vsel %vm5648_vm4, %v3502_v20, %v3211_v60  ;;  %vm3445_vm4 = vcmask 801792  }
 0x29d   : > { %v3215_v0 = vpop.permute.xlu0 %3214 }
 0x29e   : > { %v3219_v8 = vpop.permute.xlu1 %3218  ;;  %v3504_v36 = vsel %vm5649_vm5, %v3503_v9, %v3215_v0  ;;  %vm3447_vm5 = vcmask 818176  }
 0x29f   : > { %v3505_v10 = vsel %vm5650_vm6, %v3504_v36, %v3219_v8  ;;  %vm3449_vm6 = vcmask 834560  }
 0x2a1   : > { %v3223_v37 = vpop.permute.xlu0 %3222 }
 0x2a2   : > { %v3227_v31 = vpop.permute.xlu1 %3226  ;;  %v3506_v25 = vsel %vm5651_vm7, %v3505_v10, %v3223_v37  ;;  %vm3451_vm7 = vcmask 850944  }
 0x2a3   : > { %v3507_v27 = vsel %vm5652_vm8, %v3506_v25, %v3227_v31  ;;  %vm3453_vm8 = vcmask 867328  }
 0x2a5   : > { %v3231_v47 = vpop.permute.xlu0 %3230 }
 0x2a6   : > { %v3235_v51 = vpop.permute.xlu1 %3234  ;;  %v3508_v17 = vsel %vm3415_vm14, %v3507_v27, %v3231_v47  ;;  %vm3435_vm14 = vcmask 719872  }
 0x2a7   : > { %v3509_v11 = vsel %vm5653_vm9, %v3508_v17, %v3235_v51  ;;  %vm3455_vm9 = vcmask 883712  }
 0x2a9   : > { %v3239_v7 = vpop.permute.xlu0 %3238 }
 0x2aa   : > { %v3243_v4 = vpop.permute.xlu1 %3242  ;;  %v3510_v14 = vsel %vm5654_vm10, %v3509_v11, %v3239_v7  ;;  %vm3457_vm10 = vcmask 900096  }
 0x2ab   : > { %v3511_v30 = vsel %vm5655_vm11, %v3510_v14, %v3243_v4  ;;  %vm3459_vm11 = vcmask 916480  }
 0x2ad   : > { %v3247_v12 = vpop.permute.xlu0 %3246 }
 0x2ae   : > { %v3251_v22 = vpop.permute.xlu1 %3250  ;;  %v3512_v54 = vsel %vm5656_vm0, %v3511_v30, %v3247_v12  ;;  %vm3461_vm0 = vcmask 932864  }
 0x2af   : > { %v3513_v34 = vsel %vm3425_vm15, %v3512_v54, %v3251_v22  ;;  %vm3437_vm15 = vcmask 736256  }
 0x2b1   : > { %v3255_v24 = vpop.permute.xlu0 %3254 }
 0x2b2   : > { %v3259_v5 = vpop.permute.xlu1 %3258  ;;  %v3514_v21 = vsel %vm3427_vm13, %v3513_v34, %v3255_v24  ;;  %vm3433_vm13 = vcmask 703488  }
 0x2b3   : > { %v3515_v62 = vsel %vm3429_vm12, %v3514_v21, %v3259_v5  ;;  %vm3431_vm12 = vcmask 687104  }
 0x2b5   : > { %v3011_v19 = vpop.permute.xlu0 %3010 }
 0x2b6   : > { %v3263_v2 = vpop.permute.xlu1 %3262  ;;  %v3432_v1 = vsel %vm3431_vm12, %v5062_v46, %v3011_v19 }
 0x2b7   : > { %v3516_v3 = vsel %vm3431_vm12, %v3515_v62, %v3263_v2  ;;  %vm3463_vm12 = vcmask 949248  }
 0x2b9   : > { %v3015_v57 = vpop.permute.xlu0 %3014 }
 0x2ba   : > { %v3267_v38 = vpop.permute.xlu1 %3266  ;;  %v3434_v33 = vsel %vm3433_vm13, %v3432_v1, %v3015_v57 }
 0x2bb   : > { %v3517_v20 = vsel %vm3433_vm13, %v3516_v3, %v3267_v38  ;;  %vm3465_vm13 = vcmask 965632  }
 0x2bd   : > { %v3019_v41 = vpop.permute.xlu0 %3018 }
 0x2be   : > { %v3271_v29 = vpop.permute.xlu1 %3270  ;;  %v3436_v9 = vsel %vm3435_vm14, %v3434_v33, %v3019_v41 }
 0x2bf   : > { %v3518_v0 = vsel %vm3435_vm14, %v3517_v20, %v3271_v29  ;;  %vm3467_vm14 = vcmask 982016  }
 0x2c1   : > { %v3023_v35 = vpop.permute.xlu0 %3022 }
 0x2c2   : > { %v3275_v49 = vpop.permute.xlu1 %3274  ;;  %v3438_v8 = vsel %vm3437_vm15, %v3436_v9, %v3023_v35 }
 0x2c3   : > { %v3519_v36 = vsel %vm3437_vm15, %v3518_v0, %v3275_v49  ;;  %vm3469_vm15 = vcmask 998400  }
 0x2c5   : > { %v3027_v32 = vpop.permute.xlu0 %3026 }
 0x2c6   : > { %v3279_v15 = vpop.permute.xlu1 %3278  ;;  %v3440_v10 = vsel %vm3439_vm1, %v3438_v8, %v3027_v32 }
 0x2c7   : > { %v3520_v31 = vsel %vm3439_vm1, %v3519_v36, %v3279_v15  ;;  %vm3471_vm1 = vcmask 1014784  }
 0x2c9   : > { %v3031_v61 = vpop.permute.xlu0 %3030 }
 0x2ca   : > { %v3283_v44 = vpop.permute.xlu1 %3282  ;;  %v3442_v25 = vsel %vm3441_vm2, %v3440_v10, %v3031_v61 }
 0x2cb   : > { %v3521_v27 = vsel %vm3441_vm2, %v3520_v31, %v3283_v44  ;;  %vm3473_vm2 = vcmask 1031168  }
 0x2cd   : > { %v3035_v40 = vpop.permute.xlu0 %3034 }
 0x2ce   : > { %v3287_v56 = vpop.permute.xlu1 %3286  ;;  %v3444_v47 = vsel %vm3443_vm3, %v3442_v25, %v3035_v40 }
 0x2cf   : > { %v3522_v51 = vsel %vm3443_vm3, %v3521_v27, %v3287_v56  ;;  %vm5657_vm3 = vcmask 261120  }
 0x2d1   : > { %v3039_v42 = vpop.permute.xlu0 %3038 }
 0x2d2   : > { %v3291_v23 = vpop.permute.xlu1 %3290  ;;  %v3446_v17 = vsel %vm3445_vm4, %v3444_v47, %v3039_v42 }
 0x2d3   : > { %v3523_v11 = vsel %vm3445_vm4, %v3522_v51, %v3291_v23  ;;  %vm5658_vm4 = vmmov %vm5657_vm3 }
 0x2d5   : > { %v3043_v55 = vpop.permute.xlu0 %3042 }
 0x2d6   : > { %v3295_v39 = vpop.permute.xlu1 %3294  ;;  %v3448_v7 = vsel %vm3447_vm5, %v3446_v17, %v3043_v55 }
 0x2d7   : > { %v3524_v14 = vsel %vm3447_vm5, %v3523_v11, %v3295_v39  ;;  %vm5659_vm5 = vmmov %vm5657_vm3 }
 0x2d9   : > { %v3047_v26 = vpop.permute.xlu0 %3046 }
 0x2da   : > { %v3299_v50 = vpop.permute.xlu1 %3298  ;;  %v3450_v30 = vsel %vm3449_vm6, %v3448_v7, %v3047_v26 }
 0x2db   : > { %v3525_v22 = vsel %vm3449_vm6, %v3524_v14, %v3299_v50  ;;  %vm5660_vm6 = vmmov %vm5657_vm3 }
 0x2dd   : > { %v3051_v59 = vpop.permute.xlu0 %3050 }
 0x2de   : > { %v3303_v13 = vpop.permute.xlu1 %3302  ;;  %v3452_v54 = vsel %vm3451_vm7, %v3450_v30, %v3051_v59 }
 0x2df   : > { %v3526_v34 = vsel %vm3451_vm7, %v3525_v22, %v3303_v13  ;;  %vm3543_vm7 = vcmask 523520  }
 0x2e1   : > { %v3055_v6 = vpop.permute.xlu0 %3054 }
 0x2e2   : > { %v3307_v43 = vpop.permute.xlu1 %3306  ;;  %v3454_v24 = vsel %vm3453_vm8, %v3452_v54, %v3055_v6 }
 0x2e3   : > { %v3527_v5 = vsel %vm3453_vm8, %v3526_v34, %v3307_v43  ;;  %vm3545_vm8 = vcmask 785920  }
 0x2e5   : > { %v3059_v58 = vpop.permute.xlu0 %3058 }
 0x2e6   : > { %v3311_v18 = vpop.permute.xlu1 %3310  ;;  %v3456_v21 = vsel %vm3455_vm9, %v3454_v24, %v3059_v58 }
 0x2e7   : > { %v3528_v19 = vsel %vm3455_vm9, %v3527_v5, %v3311_v18  ;;  %vm3550_vm9 = vcmask 1048320  }
 0x2e9   : > { %v3063_v28 = vpop.permute.xlu0 %3062 }
 0x2ea   : > { %v3315_v63 = vpop.permute.xlu1 %3314  ;;  %v3458_v2 = vsel %vm3457_vm10, %v3456_v21, %v3063_v28 }
 0x2eb   : > { %v3529_v38 = vsel %vm3457_vm10, %v3528_v19, %v3315_v63 }
 0x2ed   : > { %v3067_v53 = vpop.permute.xlu0 %3066 }
 0x2ee   : > { %v3319_v48 = vpop.permute.xlu1 %3318  ;;  %v3460_v41 = vsel %vm3459_vm11, %v3458_v2, %v3067_v53 }
 0x2ef   : > { %v3530_v29 = vsel %vm3459_vm11, %v3529_v38, %v3319_v48 }
 0x2f1   : > { %v3071_v45 = vpop.permute.xlu0 %3070 }
 0x2f2   : > { %v3323_v16 = vpop.permute.xlu1 %3322  ;;  %v3462_v35 = vsel %vm3461_vm0, %v3460_v41, %v3071_v45 }
 0x2f3   : > { %v3531_v49 = vsel %vm3461_vm0, %v3530_v29, %v3323_v16 }
 0x2f5   : > { %v3075_v52 = vpop.permute.xlu0 %3074 }
 0x2f6   : > { %v3327_v60 = vpop.permute.xlu1 %3326  ;;  %v3464_v32 = vsel %vm3463_vm12, %v3462_v35, %v3075_v52 }
 0x2f7   : > { %v3532_v61 = vsel %vm3463_vm12, %v3531_v49, %v3327_v60 }
 0x2f9   : > { %v3079_v37 = vpop.permute.xlu0 %3078 }
 0x2fa   : > { %v3331_v46 = vpop.permute.xlu1 %3330  ;;  %v3466_v44 = vsel %vm3465_vm13, %v3464_v32, %v3079_v37 }
 0x2fb   : > { %v3533_v56 = vsel %vm3465_vm13, %v3532_v61, %v3331_v46 }
 0x2fd   : > { %v3083_v4 = vpop.permute.xlu0 %3082 }
 0x2fe   : > { %v3335_v12 = vpop.permute.xlu1 %3334  ;;  %v3468_v42 = vsel %vm3467_vm14, %v3466_v44, %v3083_v4 }
 0x2ff   : > { %v3534_v23 = vsel %vm3467_vm14, %v3533_v56, %v3335_v12 }
 0x301   : > { %v3087_v62 = vpop.permute.xlu0 %3086 }
 0x302   : > { %v3339_v57 = vpop.permute.xlu1 %3338  ;;  %v3470_v55 = vsel %vm3469_vm15, %v3468_v42, %v3087_v62 }
 0x303   : > { %v3535_v39 = vsel %vm3469_vm15, %v3534_v23, %v3339_v57 }
 0x305   : > { %v3091_v15 = vpop.permute.xlu0 %3090 }
 0x306   : > { %v3343_v40 = vpop.permute.xlu1 %3342  ;;  %v3472_v26 = vsel %vm3471_vm1, %v3470_v55, %v3091_v15 }
 0x307   : > { %v3536_v59 = vsel %vm3471_vm1, %v3535_v39, %v3343_v40 }
 0x309   : > { %v3095_v50 = vpop.permute.xlu0 %3094 }
 0x30a   : > { %v3347_v13 = vpop.permute.xlu1 %3346  ;;  %v3474_v6 = vsel %vm3473_vm2, %v3472_v26, %v3095_v50 }
 0x30b   : > { %v3537_v43 = vsel %vm3473_vm2, %v3536_v59, %v3347_v13  ;;  %3538 = vst.msk [vmem:[%s5225_s11] sm:$0xff] %vm5657_vm3, %v3474_v6  ;;  %3547 = vrot.lane.b32.xlu0 %v3474_v6, %s5585_s22 }
 0x30c   : > { %3559 = vst.msk [vmem:[%s5225_s11 + $0x10] sm:$0xff] %vm5658_vm4, %v3537_v43  ;;  %3566 = vrot.lane.b32.xlu1 %v3537_v43, %s5585_s22  ;;  %s3592_s22 = sshll.u32 %s5225_s11, 4  ;;  %s5266_s22 = int_to_ptr.vmem [resolvable:$true] %s3592_s22 }
 0x30d   : > { %s3817_s16 = scalar_lea.vmem %s5266_s22, 512  ;;  %p3824_p7 = scmp.lt.s32.totalorder %s5266_s22, %s3822_s26 }
 0x30e   : > { %p3818_p6 = scmp.ne.s32.totalorder %s5266_s22, %s3817_s16  ;;  %p3825_p10 = scmp.lt.s32.totalorder %s3823_s20, %s3817_s16 }
 0x30f   : > { %3540 = vrot.lane.b32.xlu0 %v3474_v6, %s5553_s17 }
 0x310   : > { %3553 = vrot.lane.b32.xlu1 %v3474_v6, %s3935_s5  ;;  %p3819_p12 = pnand %p3818_p6, %p5661_p11  ;;  %p3826_p2 = por %p3825_p10, %p3824_p7 }
 0x312   : > { %p3820_p13 = pneg %p3819_p12 }
 0x313   : > { %3561 = vrot.lane.b32.xlu0 %v3537_v43, %s5553_s17  ;;  %s3675_s17 = sshll.u32 %s3983_s10, 9  ;;  %s3578_s10 = scalar_lea.sflag [#allocation4], %s4067_s21 }
 0x314   : > { %3571 = vrot.lane.b32.xlu1 %v3537_v43, %s3935_s5  ;;  %s5264_s14 = scalar_lea.hbm %s5315_s1, %s3675_s17  ;;  %p3827_p4 = pnand %p3826_p2, %p3820_p13 }
 0x37d   : > { %v3548_v58 = vpop.permute.xlu0 %3547 }
 0x37e   : > { %v3567_v18 = vpop.permute.xlu1 %3566  ;;  %3552 = vst.msk [vmem:[%s5225_s11 + $0x8] sm:$0xff] %vm5659_vm5, %v3548_v58 }
 0x37f   : > { %3570 = vst.msk [vmem:[%s5225_s11 + $0x18] sm:$0xff] %vm5660_vm6, %v3567_v18 }
 0x381   : > { %v3541_v28 = vpop.permute.xlu0 %3540 }
 0x382   : > { %v3554_v63 = vpop.permute.xlu1 %3553  ;;  %3544 = vst.msk [vmem:[%s5225_s11] sm:$0xff] %vm3543_vm7, %v3541_v28 }
 0x383   : > { %3556 = vst.msk [vmem:[%s5225_s11 + $0x8] sm:$0xff] %vm3543_vm7, %v3554_v63 }
 0x384   : > { %3546 = vst.msk [vmem:[%s5225_s11] sm:$0xff] %vm3545_vm8, %v3541_v28  ;;  %3557 = vst.msk [vmem:[%s5225_s11 + $0x8] sm:$0xff] %vm3545_vm8, %v3554_v63 }
 0x385   : > { %3551 = vst.msk [vmem:[%s5225_s11] sm:$0xff] %vm3550_vm9, %v3548_v58  ;;  %3558 = vst.msk [vmem:[%s5225_s11 + $0x8] sm:$0xff] %vm3550_vm9, %v3474_v6  ;;  %v3562_v53 = vpop.permute.xlu0 %3561 }
 0x386   : > { %v3572_v48 = vpop.permute.xlu1 %3571  ;;  %3564 = vst.msk [vmem:[%s5225_s11 + $0x10] sm:$0xff] %vm3543_vm7, %v3562_v53 }
 0x387   : > { %3574 = vst.msk [vmem:[%s5225_s11 + $0x18] sm:$0xff] %vm3543_vm7, %v3572_v48 }
 0x388   : > { %3565 = vst.msk [vmem:[%s5225_s11 + $0x10] sm:$0xff] %vm3545_vm8, %v3562_v53  ;;  %3575 = vst.msk [vmem:[%s5225_s11 + $0x18] sm:$0xff] %vm3545_vm8, %v3572_v48 }
 0x389   : > { %3569 = vst.msk [vmem:[%s5225_s11 + $0x10] sm:$0xff] %vm3550_vm9, %v3567_v18  ;;  %3576 = vst.msk [vmem:[%s5225_s11 + $0x18] sm:$0xff] %vm3550_vm9, %v3537_v43 }
 0x38a   : > { %3830 = shalt.err (!%p3827_p4)
}
 0x38b   : > { %s3831_s21 = scalar_lea.hbm %s5264_s14, 512  ;;  %s3835_s29 = scalar_lea.hbm %s5315_s1, 1024 }
 0x38c   : > { %p3832_p5 = scmp.ne.s32.totalorder %s5264_s14, %s3831_s21  ;;  %p3836_p0 = scmp.lt.u32.totalorder %s5264_s14, %s5315_s1 }
 0x38d   : > { %p3837_p1 = scmp.lt.u32.totalorder %s3835_s29, %s3831_s21  ;;  %p3839_p6 = scmp.lt.u32.totalorder %s3831_s21, %s5264_s14 }
 0x38e   : > { %p3833_p8 = pnand %p3832_p5, %p5661_p11 }
 0x38f   : > { %p3838_p3 = por %p3837_p1, %p3836_p0 }
 0x390   : > { %p3834_p9 = pneg %p3833_p8 }
 0x391   : > { %p3840_p12 = por %p3839_p6, %p3838_p3 }
 0x393   : > { %p3841_p13 = pnand %p3840_p12, %p3834_p9 }
 0x395   : > { %3844 = shalt.err (!%p3841_p13)
}
 0x396   : > { %3678 = dma.vmem_to_hbm [thread:$0]  (%p5661_p11), %s5266_s22, 512, %s5264_s14, %s3578_s10  }
 0x397 PF: > { %s3604_s30 = sand.u32 1, %s3871_s6   ;;  %p5662_p7 = scmp.ne.s32.totalorder %s5448_s19, 0 }
 0x398   : > { %p5663_p10 = scmp.ge.s32.totalorder %s3883_s9, 2  ;;  %s3605_s2 = scalar_lea.sflag [#allocation4], %s3604_s30 }
 0x39a   : > { %p3685_p2 = pnand %p5663_p10, %p5662_p7 }
 0x39c   : > { %3866 = dma.done.wait (!%p3685_p2), %s3605_s2, 512  }
 0x39d   : > { %3868 = vsyncadd (!%p3685_p2), %s3605_s2, 4294966784  ;;  %p14_p4 = scmp.ge.s32.totalorder %s3987_s12, 4   ;;  %s5664_s6 = smov %s3875_s7 }
 0x39e   : > { %s5665_s7 = smov %s3879_s8  ;;  %s5666_s8 = smov %s3999_s15 }
 0x39f   : > { %s5667_s9 = smov %s3987_s12  ;;  %16 = sbr.rel (!%p14_p4) target bundleno = 5 (0x5), region = 69 }
 0x3a6   :  { %3610 = vsyncpa [#allocation3], 1 }
 0x3a7   :  { %3612 = vsyncpa [#allocation3 + $0x1], 1 }
 0x3a8   :  { %3613 = vsyncpa [#allocation4], 1 }
 0x3a9   :  { %3615 = vsyncpa [#allocation4 + $0x1], 1 }

</bundles_post_ra>
